<compile_context>
chip_gen: v6e
topology: v6e:2x2x1
jax: 0.10.0
libtpu: 0.0.40
codegen_flags: <defaults>
</compile_context>

<pallas_src>
from functools import partial

import jax
import jax.numpy as jnp
from jax.experimental import pallas as pl
from jax.experimental.pallas import tpu as pltpu


def _round_up(x, m):
    return ((x + m - 1) // m) * m


def _vmem_limit_bytes():
    """Generation-aware scoped-VMEM limit (leave ~25% headroom)."""
    try:
        cap = pltpu.get_tpu_info().vmem_capacity_bytes   # 128 MiB v5e/v6e, 64 MiB v7x
    except Exception:
        cap = 64 * 1024 * 1024
    return int(cap * 3 // 4)


def _attention_kernel(img_ref, hid_ref, uw_ref, ww_ref, bias_ref, vrow_ref,
                      ctx_ref, alpha_ref, *, n_valid):
    # img_ref  : (TB, Np, Dp)  bf16     hid_ref   : (TB, Rp)  bf16
    # uw_ref   : (Rp, Rp)      bf16     ww_ref    : (Dp, Rp)  bf16
    # bias_ref : (1, Rp)  f32  (U_b + W_b folded; v bias cancels in softmax)
    # vrow_ref : (1, Rp)  f32  (v weight row -> VPU multiply + lane reduce)
    # ctx_ref  : (TB, Dp) f32          alpha_ref : (TB, Np) f32
    TB, Np, Dp = img_ref.shape
    Rp = uw_ref.shape[1]

    img = img_ref[...]                                    # (TB, Np, Dp) bf16
    hid = hid_ref[...]                                    # (TB, Rp)     bf16

    # U(hidden) + folded bias  -> (TB, Rp)    (MXU, bf16 operands, f32 acc)
    u_h = (jnp.dot(hid, uw_ref[...], preferred_element_type=jnp.float32)
           + bias_ref[...])

    # W(img) as ONE wide matmul: (TB*Np, Dp) @ (Dp, Rp)   (MXU, M = TB*Np)
    w_s = jnp.dot(img.reshape(TB * Np, Dp), ww_ref[...],
                  preferred_element_type=jnp.float32).reshape(TB, Np, Rp)

    # att = tanh(W_s + U_h)  (per-batch broadcast over regions)  -> f32, EUP
    att = jnp.tanh(w_s + u_h[:, None, :])

    # e = v(att): 1-column projection on VPU (mul) + XLU (lane reduce).
    e = jnp.sum(att * vrow_ref[...][None, :, :], axis=-1)        # (TB, Np) f32

    # Mask padded region columns before the softmax (zero-padded img rows give
    # a finite score, NOT -inf, so they must be masked explicitly).
    if n_valid < Np:
        col = jax.lax.broadcasted_iota(jnp.int32, (TB, Np), 1)
        e = jnp.where(col < n_valid, e, jnp.float32(-1e30))

    # Row-wise, max-stabilized softmax over regions (dim=1 in torch).
    e_max = jnp.max(e, axis=-1, keepdims=True)
    p = jnp.exp(e - e_max)
    denom = jnp.sum(p, axis=-1, keepdims=True)
    alpha = p / denom                 # exact divide: (TB,1)-shaped, negligible

    # context = sum_n alpha_n * img_n  -> (TB, Dp)
    # (VPU mul + sublane reduce; f32 accumulation, safe on v5e.)
    ctx = jnp.sum(alpha[:, :, None] * img.astype(jnp.float32), axis=1)

    ctx_ref[...] = ctx.astype(ctx_ref.dtype)
    alpha_ref[...] = alpha.astype(alpha_ref.dtype)


def attention_pallas(img_features, hidden_state, params, *, block_b=32):
    """img_features: (B, N, D_enc), hidden_state: (B, R) -> (context, alpha)."""
    B, N, D_enc = img_features.shape
    R = hidden_state.shape[1]

    # --- Pad feature dims (zero-padding is exact for this module). ---------
    Dp = _round_up(D_enc, 128)     # dense MXU K / lane-dense ctx store
    Rp = _round_up(R, 128)         # dense MXU N/K
    Np = _round_up(N, 16)          # bf16 sublane tile -> copy-free (TB,N,D)<->(TB*N,D)

    vmem_limit = _vmem_limit_bytes()

    # --- Batch tile: multiple of 8, no bigger than the (padded) batch, and
    #     capped so the resident working set fits the scoped-VMEM budget. ----
    TB = max(8, min(_round_up(block_b, 8), _round_up(B, 8)))

    def _step_bytes(tb):
        img_tile = tb * Np * Dp * 2 * 2               # bf16 img, double-buffered
        inter = tb * Np * Rp * 4 * 2                  # w_s + att (f32)
        outs = (tb * Dp * 4 + tb * Np * 4) * 2        # ctx + alpha, double-buffered
        weights = (Rp * Rp + Dp * Rp) * 2 + 2 * Rp * 4  # single-buffered constants
        small = tb * Rp * (2 * 2 + 4)                 # hid (bf16 x2) + u_h (f32)
        return img_tile + inter + outs + weights + small

    while TB > 8 and _step_bytes(TB) > int(0.6 * vmem_limit):
        TB -= 8
    Bp = _round_up(B, TB)

    # --- Weights: pre-transpose to (in, out), zero-pad, bf16 for the MXU. ---
    # The v bias adds the same constant to every score -> cancels in softmax.
    uw = (jnp.zeros((Rp, Rp), jnp.float32)
          .at[:R, :R].set(params["U_w"].T.astype(jnp.float32))
          .astype(jnp.bfloat16))
    ww = (jnp.zeros((Dp, Rp), jnp.float32)
          .at[:D_enc, :R].set(params["W_w"].T.astype(jnp.float32))
          .astype(jnp.bfloat16))
    bias = (jnp.zeros((1, Rp), jnp.float32)
            .at[:, :R].set((params["U_b"] + params["W_b"])[None, :]
                           .astype(jnp.float32)))
    vrow = (jnp.zeros((1, Rp), jnp.float32)
            .at[:, :R].set(params["v_w"].astype(jnp.float32)))

    # --- Activations: zero-pad batch / regions / features, bf16 for the MXU.
    img = (jnp.zeros((Bp, Np, Dp), jnp.bfloat16)
           .at[:B, :N, :D_enc].set(img_features.astype(jnp.bfloat16)))
    hid = (jnp.zeros((Bp, Rp), jnp.bfloat16)
           .at[:B, :R].set(hidden_state.astype(jnp.bfloat16)))

    grid = (Bp // TB,)
    const_kwargs = dict(pipeline_mode=pl.Buffered(1))   # grid-invariant operands

    ctx, alpha = pl.pallas_call(
        partial(_attention_kernel, n_valid=N),
        out_shape=(
            jax.ShapeDtypeStruct((Bp, Dp), jnp.float32),
            jax.ShapeDtypeStruct((Bp, Np), jnp.float32),
        ),
        grid_spec=pltpu.PrefetchScalarGridSpec(
            num_scalar_prefetch=0,
            grid=grid,
            in_specs=[
                pl.BlockSpec((TB, Np, Dp), lambda b: (b, 0, 0)),       # img
                pl.BlockSpec((TB, Rp),     lambda b: (b, 0)),          # hidden
                pl.BlockSpec((Rp, Rp),     lambda b: (0, 0), **const_kwargs),  # U weight
                pl.BlockSpec((Dp, Rp),     lambda b: (0, 0), **const_kwargs),  # W weight
                pl.BlockSpec((1, Rp),      lambda b: (0, 0), **const_kwargs),  # folded bias
                pl.BlockSpec((1, Rp),      lambda b: (0, 0), **const_kwargs),  # v weight row
            ],
            out_specs=[
                pl.BlockSpec((TB, Dp), lambda b: (b, 0)),              # context
                pl.BlockSpec((TB, Np), lambda b: (b, 0)),              # alpha
            ],
        ),
        compiler_params=pltpu.CompilerParams(
            dimension_semantics=("parallel",),       # megacore / v7x 2-TC sharding
            vmem_limit_bytes=vmem_limit),
    )(img, hid, uw, ww, bias, vrow)

    return ctx[:B, :D_enc], alpha[:B, :N]


def attention_ref(img_features, hidden_state, params):
    """Plain-JAX reference of the PyTorch forward."""
    u_h = hidden_state @ params["U_w"].T + params["U_b"]          # (B, R)
    w_s = img_features @ params["W_w"].T + params["W_b"]          # (B, N, R)
    att = jnp.tanh(w_s + u_h[:, None, :])
    e = (att @ params["v_w"].T + params["v_b"])[..., 0]           # (B, N)
    alpha = jax.nn.softmax(e, axis=1)
    context = (img_features * alpha[..., None]).sum(axis=1)       # (B, D_enc)
    return context, alpha


if __name__ == "__main__":
    # Small, deliberately unaligned shapes: exercises R/D padding to 128, the
    # N->16 padding + score masking, the batch tiling (grid of 2 parallel
    # steps -> both TCs on v7x), and the padded-batch slice-off.
    B, N, D_enc, R = 32, 24, 40, 48

    key = jax.random.PRNGKey(0)
    k_img, k_hid, k_uw, k_ub, k_ww, k_wb, k_vw, k_vb = jax.random.split(key, 8)

    img_features = jax.random.normal(k_img, (B, N, D_enc), dtype=jnp.float32)
    hidden_state = jax.random.normal(k_hid, (B, R), dtype=jnp.float32)

    # PyTorch nn.Linear weight shape is (out_features, in_features).
    params = {
        "U_w": 0.1 * jax.random.normal(k_uw, (R, R), dtype=jnp.float32),
        "U_b": 0.1 * jax.random.normal(k_ub, (R,), dtype=jnp.float32),
        "W_w": 0.1 * jax.random.normal(k_ww, (R, D_enc), dtype=jnp.float32),
        "W_b": 0.1 * jax.random.normal(k_wb, (R,), dtype=jnp.float32),
        "v_w": 0.1 * jax.random.normal(k_vw, (1, R), dtype=jnp.float32),
        "v_b": 0.1 * jax.random.normal(k_vb, (1,), dtype=jnp.float32),
    }

    ctx, alpha = attention_pallas(img_features, hidden_state, params, block_b=16)
    jax.block_until_ready((ctx, alpha))

    ctx_ref, alpha_ref = attention_ref(img_features, hidden_state, params)
    # Tolerance covers bf16 MXU operands (f32 accumulation keeps drift small).
    assert jnp.allclose(ctx, ctx_ref, atol=2e-2, rtol=2e-2), "context mismatch"
    assert jnp.allclose(alpha, alpha_ref, atol=2e-2, rtol=2e-2), "alpha mismatch"
    # Exact softmax divide -> rows normalize to f32 precision.
    assert jnp.allclose(jnp.sum(alpha, axis=1), 1.0, atol=1e-5), "alpha not normalized"

    print("KERNEL_OK")
</pallas_src>

<mosaic_0001>
module attributes {stable_mosaic.version = 11 : i64} {
  func.func @_attention_kernel(%arg0: i32, %arg1: memref<16x32x128xbf16, #tpu.memory_space<vmem>>, %arg2: memref<16x128xbf16, #tpu.memory_space<vmem>>, %arg3: memref<128x128xbf16, #tpu.memory_space<vmem>>, %arg4: memref<128x128xbf16, #tpu.memory_space<vmem>>, %arg5: memref<1x128xf32, #tpu.memory_space<vmem>>, %arg6: memref<1x128xf32, #tpu.memory_space<vmem>>, %arg7: memref<16x128xf32, #tpu.memory_space<vmem>>, %arg8: memref<16x32xf32, #tpu.memory_space<vmem>>) attributes {dimension_semantics = [#tpu.dimension_semantics<parallel>], iteration_bounds = array<i64: 2>, scalar_prefetch = 0 : i64, scratch_operands = 0 : i64, tpu.core_type = #tpu.core_type<tc>, window_params = [{transform_indices = @transform_0, window_bounds = array<i64: 16, 32, 128>}, {transform_indices = @transform_1, window_bounds = array<i64: 16, 128>}, {pipeline_mode = #tpu.pipeline_mode<synchronous>, transform_indices = @transform_2, window_bounds = array<i64: 128, 128>}, {pipeline_mode = #tpu.pipeline_mode<synchronous>, transform_indices = @transform_3, window_bounds = array<i64: 128, 128>}, {pipeline_mode = #tpu.pipeline_mode<synchronous>, transform_indices = @transform_4, window_bounds = array<i64: 1, 128>}, {pipeline_mode = #tpu.pipeline_mode<synchronous>, transform_indices = @transform_5, window_bounds = array<i64: 1, 128>}, {transform_indices = @transform_6, window_bounds = array<i64: 16, 128>}, {transform_indices = @transform_7, window_bounds = array<i64: 16, 32>}]} {
    %c0 = arith.constant 0 : index
    %c0_0 = arith.constant 0 : index
    %c0_1 = arith.constant 0 : index
    %0 = vector.load %arg1[%c0, %c0_0, %c0_1] : memref<16x32x128xbf16, #tpu.memory_space<vmem>>, vector<16x32x128xbf16>
    %c0_2 = arith.constant 0 : index
    %c0_3 = arith.constant 0 : index
    %1 = vector.load %arg2[%c0_2, %c0_3] : memref<16x128xbf16, #tpu.memory_space<vmem>>, vector<16x128xbf16>
    %c0_4 = arith.constant 0 : index
    %c0_5 = arith.constant 0 : index
    %2 = vector.load %arg3[%c0_4, %c0_5] : memref<128x128xbf16, #tpu.memory_space<vmem>>, vector<128x128xbf16>
    %cst = arith.constant dense<0.000000e+00> : vector<16x128xf32>
    %3 = tpu.matmul %1, %2, %cst {dimension_numbers = #tpu.dot_dimension_numbers<[1], [0], [0], [1], [0, 0, 1, 1], [], []>} : vector<16x128xbf16>, vector<128x128xbf16>, vector<16x128xf32> -> vector<16x128xf32>
    %c0_6 = arith.constant 0 : index
    %c0_7 = arith.constant 0 : index
    %4 = vector.load %arg5[%c0_6, %c0_7] : memref<1x128xf32, #tpu.memory_space<vmem>>, vector<1x128xf32>
    %5 = vector.broadcast %4 : vector<1x128xf32> to vector<16x128xf32>
    %6 = arith.addf %3, %5 : vector<16x128xf32>
    %7 = vector.shape_cast %0 : vector<16x32x128xbf16> to vector<512x128xbf16>
    %c0_8 = arith.constant 0 : index
    %c0_9 = arith.constant 0 : index
    %8 = vector.load %arg4[%c0_8, %c0_9] : memref<128x128xbf16, #tpu.memory_space<vmem>>, vector<128x128xbf16>
    %cst_10 = arith.constant dense<0.000000e+00> : vector<512x128xf32>
    %9 = tpu.matmul %7, %8, %cst_10 {dimension_numbers = #tpu.dot_dimension_numbers<[1], [0], [0], [1], [0, 0, 1, 1], [], []>} : vector<512x128xbf16>, vector<128x128xbf16>, vector<512x128xf32> -> vector<512x128xf32>
    %10 = vector.shape_cast %9 : vector<512x128xf32> to vector<16x32x128xf32>
    %11 = vector.shape_cast %6 : vector<16x128xf32> to vector<16x1x128xf32>
    %12 = vector.broadcast %11 : vector<16x1x128xf32> to vector<16x32x128xf32>
    %13 = arith.addf %10, %12 : vector<16x32x128xf32>
    %14 = math.tanh %13 : vector<16x32x128xf32>
    %c0_11 = arith.constant 0 : index
    %c0_12 = arith.constant 0 : index
    %15 = vector.load %arg6[%c0_11, %c0_12] : memref<1x128xf32, #tpu.memory_space<vmem>>, vector<1x128xf32>
    %16 = vector.shape_cast %15 : vector<1x128xf32> to vector<1x1x128xf32>
    %17 = vector.broadcast %16 : vector<1x1x128xf32> to vector<16x32x128xf32>
    %18 = arith.mulf %14, %17 : vector<16x32x128xf32>
    %cst_13 = arith.constant dense<0.000000e+00> : vector<16x32xf32>
    %19 = vector.multi_reduction <add>, %18, %cst_13 [2] : vector<16x32x128xf32> to vector<16x32xf32>
    %20 = tpu.iota {dimensions = array<i32: 1>} : vector<16x32xi32>
    %c24_i32 = arith.constant 24 : i32
    %21 = vector.broadcast %c24_i32 : i32 to vector<16x32xi32>
    %22 = arith.cmpi slt, %20, %21 : vector<16x32xi32>
    %cst_14 = arith.constant -1.000000e+30 : f32
    %23 = vector.broadcast %cst_14 : f32 to vector<16x32xf32>
    %24 = arith.select %22, %19, %23 : vector<16x32xi1>, vector<16x32xf32>
    %cst_15 = arith.constant dense<0xFF800000> : vector<16xf32>
    %25 = vector.multi_reduction <maximumf>, %24, %cst_15 [1] : vector<16x32xf32> to vector<16xf32>
    %26 = vector.shape_cast %25 : vector<16xf32> to vector<16x1xf32>
    %27 = vector.broadcast %26 : vector<16x1xf32> to vector<16x32xf32>
    %28 = arith.subf %24, %27 : vector<16x32xf32>
    %29 = math.exp %28 : vector<16x32xf32>
    %cst_16 = arith.constant dense<0.000000e+00> : vector<16xf32>
    %30 = vector.multi_reduction <add>, %29, %cst_16 [1] : vector<16x32xf32> to vector<16xf32>
    %31 = vector.shape_cast %30 : vector<16xf32> to vector<16x1xf32>
    %32 = vector.broadcast %31 : vector<16x1xf32> to vector<16x32xf32>
    %33 = arith.divf %29, %32 : vector<16x32xf32>
    %34 = vector.shape_cast %33 : vector<16x32xf32> to vector<16x32x1xf32>
    %35 = arith.extf %0 : vector<16x32x128xbf16> to vector<16x32x128xf32>
    %36 = vector.broadcast %34 : vector<16x32x1xf32> to vector<16x32x128xf32>
    %37 = arith.mulf %36, %35 : vector<16x32x128xf32>
    %cst_17 = arith.constant dense<0.000000e+00> : vector<16x128xf32>
    %38 = vector.multi_reduction <add>, %37, %cst_17 [1] : vector<16x32x128xf32> to vector<16x128xf32>
    %c0_18 = arith.constant 0 : index
    %c0_19 = arith.constant 0 : index
    %39 = vector.load %arg7[%c0_18, %c0_19] : memref<16x128xf32, #tpu.memory_space<vmem>>, vector<16x128xf32>
    tpu.vector_store %arg7[%c0_18, %c0_19], %38 {strides = array<i32>} : memref<16x128xf32, #tpu.memory_space<vmem>>, vector<16x128xf32>,
    %c0_20 = arith.constant 0 : index
    %c0_21 = arith.constant 0 : index
    %40 = vector.load %arg8[%c0_20, %c0_21] : memref<16x32xf32, #tpu.memory_space<vmem>>, vector<16x32xf32>
    tpu.vector_store %arg8[%c0_20, %c0_21], %33 {strides = array<i32>} : memref<16x32xf32, #tpu.memory_space<vmem>>, vector<16x32xf32>,
    return
  }
  func.func @transform_0(%arg0: i32) -> (i32, i32, i32) {
    %c0_i32 = arith.constant 0 : i32
    %c0_i32_0 = arith.constant 0 : i32
    %c0_i32_1 = arith.constant 0 : i32
    return %arg0, %c0_i32, %c0_i32_0 : i32, i32, i32
  }
  func.func @transform_1(%arg0: i32) -> (i32, i32) {
    %c0_i32 = arith.constant 0 : i32
    %c0_i32_0 = arith.constant 0 : i32
    return %arg0, %c0_i32 : i32, i32
  }
  func.func @transform_2(%arg0: i32) -> (i32, i32) {
    %c0_i32 = arith.constant 0 : i32
    %c0_i32_0 = arith.constant 0 : i32
    %c0_i32_1 = arith.constant 0 : i32
    return %c0_i32, %c0_i32_0 : i32, i32
  }
  func.func @transform_3(%arg0: i32) -> (i32, i32) {
    %c0_i32 = arith.constant 0 : i32
    %c0_i32_0 = arith.constant 0 : i32
    %c0_i32_1 = arith.constant 0 : i32
    return %c0_i32, %c0_i32_0 : i32, i32
  }
  func.func @transform_4(%arg0: i32) -> (i32, i32) {
    %c0_i32 = arith.constant 0 : i32
    %c0_i32_0 = arith.constant 0 : i32
    %c0_i32_1 = arith.constant 0 : i32
    return %c0_i32, %c0_i32_0 : i32, i32
  }
  func.func @transform_5(%arg0: i32) -> (i32, i32) {
    %c0_i32 = arith.constant 0 : i32
    %c0_i32_0 = arith.constant 0 : i32
    %c0_i32_1 = arith.constant 0 : i32
    return %c0_i32, %c0_i32_0 : i32, i32
  }
  func.func @transform_6(%arg0: i32) -> (i32, i32) {
    %c0_i32 = arith.constant 0 : i32
    %c0_i32_0 = arith.constant 0 : i32
    return %arg0, %c0_i32 : i32, i32
  }
  func.func @transform_7(%arg0: i32) -> (i32, i32) {
    %c0_i32 = arith.constant 0 : i32
    %c0_i32_0 = arith.constant 0 : i32
    return %arg0, %c0_i32 : i32, i32
  }
}

</mosaic_0001>

<bundles_post_ra>
// kernel: tpu_custom_call.1
= control target key start
LH: loop header
LB: loop body
LE: loop exit
PB: predicated region body
PF: predicated region fallthrough
CT: control target
= control target key end

     0   :  { %s4679_s0 = inlined_call_operand.hbm [shape: bf16[32,32,128], index: 0, kind: input, shape index: {}]   ;;  %s4680_s1 = inlined_call_operand.hbm [shape: bf16[32,128], index: 1, kind: input, shape index: {}]   ;;  %s4681_s2 = inlined_call_operand.hbm [shape: bf16[128,128], index: 2, kind: input, shape index: {}]   ;;  %s4682_s3 = inlined_call_operand.hbm [shape: bf16[128,128], index: 3, kind: input, shape index: {}]   ;;  %s4683_s4 = inlined_call_operand.vmem [shape: f32[1,128], index: 4, kind: input, shape index: {}]   ;;  %s4684_s5 = inlined_call_operand.vmem [shape: f32[1,128], index: 5, kind: input, shape index: {}]   ;;  %s4685_s6 = inlined_call_operand.hbm [shape: f32[32,128], index: 6, kind: output, shape index: {0}]   ;;  %s4686_s7 = inlined_call_operand.hbm [shape: f32[32,32], index: 7, kind: output, shape index: {1}]  }
   0x1   :  { %4697 = sst [smem:[#allocation22_spill]] %s4679_s0 }
   0x2   :  { %4698 = sst [smem:[#allocation23_spill]] %s4681_s2 }
   0x3   :  { %4699 = sst [smem:[#allocation24_spill]] %s4682_s3 }
   0x4   :  { %13 = vsyncpa [#allocation3], 0 }
   0x5   :  { %15 = vsyncpa [#allocation3 + $0x1], 0 }
   0x6   :  { %16 = vsyncpa [#allocation6], 0 }
   0x7   :  { %18 = vsyncpa [#allocation6 + $0x1], 0 }
   0x8   :  { %19 = vsyncpa [#allocation9], 0 }
   0x9   :  { %20 = vsyncpa [#allocation4], 0 }
   0xa   :  { %22 = vsyncpa [#allocation4 + $0x1], 0 }
   0xb   :  { %23 = vsyncpa [#allocation12], 0 }
   0xc   :  { %25 = vsyncpa [#allocation12 + $0x1], 0  ;;  %s3688_s24 = smov 0   ;;  %s3690_s25 = smov 0  }
   0xd   :  { %s3692_s26 = smov 0   ;;  %s3694_s27 = smov 0  }
   0xe LB: > { %4700 = sst [smem:[#allocation19_spill]] %s3629_s26  ;;  %s3709_s28 = sadd.s32 4294967295, %s3633_s27   ;;  %s3633_s27 = sphi %s3694_s27, %s4729_s27   ;;  %s3629_s26 = sphi %s3692_s26, %s4726_s26   ;;  %s3625_s25 = sphi %s3690_s25, %s4728_s25   ;;  %s3621_s24 = sphi %s3688_s24, %s4727_s24  }
   0xf   : > { %s2838_s29 = sadd.s32 4294967294, %s3633_s27   ;;  %p51_p0 = scmp.ne.s32.totalorder %s3625_s25, %s3621_s24 }
  0x10   : > { %p4691_p1 = scmp.eq.s32.totalorder %s3709_s28, 0  ;;  %p185_p2 = scmp.eq.s32.totalorder %s3709_s28, 1 }
  0x11   : > { %p191_p3 = scmp.eq.s32.totalorder %s2838_s29, 1  ;;  %p2839_p5 = scmp.ge.s32.totalorder %s3633_s27, 1 }
  0x12   : > { %p3718_p4 = por %p4691_p1, %p51_p0  ;;  %p224_p7 = scmp.lt.s32.totalorder %s3633_s27, 3 }
  0x13   : > { %p3723_p6 = por %p191_p3, %p51_p0  ;;  %s3635_s10 = smov [#allocation7]  }
  0x14   : > { %s4701_s30 = scalar_select %p3718_p4, 1, 0 }
  0x15   : > { %s4702_s8 = scalar_select %p3723_p6, 1, 0 }
  0x16   : > { %p3728_p8 = pnand %p2839_p5, %p224_p7  ;;  %s236_s11 = sshll.u32 %s3635_s10, 4  ;;  %s237_s11 = int_to_ptr.vmem [resolvable:$true] %s236_s11 }
  0x17   : > { %s3636_s13 = smov [#allocation8]   ;;  %s3430_s15 = scalar_lea.vmem %s237_s11, 1024 }
  0x18   : > { %p3102_p9 = pneg %p3728_p8  ;;  %s249_s14 = sshll.u32 %s3636_s13, 4  ;;  %s250_s14 = int_to_ptr.vmem [resolvable:$true] %s249_s14 }
  0x19   : > { %p3431_p13 = scmp.ne.s32.totalorder %s237_s11, %s3430_s15  ;;  %p3438_p5 = scmp.lt.s32.totalorder %s237_s11, %s237_s11 }
  0x1a   : > { %p3737_p11 = pnand %p3102_p9, %p4691_p1  ;;  %p3439_p7 = scmp.lt.s32.totalorder %s3430_s15, %s3430_s15 }
  0x1c   : > { %p3421_p12 = pneg %p3737_p11  ;;  %p3440_p10 = por %p3439_p7, %p3438_p5 }
  0x1e   : > { %p3433_p0 = pnand %p3431_p13, %p3421_p12 }
  0x20   : > { %p3434_p3 = pneg %p3433_p0 }
  0x22   : > { %p3441_p9 = pnand %p3440_p10, %p3434_p3 }
  0x24   : > { %3444 = shalt.err (!%p3441_p9)
}
  0x25   : > { %s4687_s16 = smov 64   ;;  %s4689_s17 = smov 4  }
  0x26   : > { %s4705_s2 = sld [smem:[#allocation23_spill]]  ;;  %s3456_s20 = scalar_lea.vmem %s250_s14, 1024 }
  0x27   : > { %p3457_p13 = scmp.ne.s32.totalorder %s250_s14, %s3456_s20  ;;  %p3464_p10 = scmp.lt.s32.totalorder %s250_s14, %s250_s14 }
  0x28   : > { %p3465_p3 = scmp.lt.s32.totalorder %s3456_s20, %s3456_s20 }
  0x29   : > { %p3459_p0 = pnand %p3457_p13, %p3421_p12 }
  0x2a   : > { %p3466_p7 = por %p3465_p3, %p3464_p10 }
  0x2b   : > { %p3460_p5 = pneg %p3459_p0 }
  0x2c   : > { %3105 = dma.hbm_to_vmem [thread:$0]  (!%p3737_p11), %s4705_s2, 1024, %s237_s11, [#allocation6], %s4687_s16, %s4687_s16, %s4689_s17  }
  0x2d   : > { %p3467_p9 = pnand %p3466_p7, %p3460_p5 }
  0x2f   : > { %3470 = shalt.err (!%p3467_p9)
}
  0x30   : > { %s4706_s3 = sld [smem:[#allocation24_spill]]  ;;  %s3766_s23 = sadd.s32 1, %s3633_s27  }
  0x31   : > { %s38_s29 = sadd.s32 1, %s3629_s26  ;;  %s35_s10 = ssub.s32 %s3633_s27, %s3766_s23 }
  0x32   : > { %p45_p12 = scmp.ne.s32.totalorder %s3629_s26, %s3625_s25  ;;  %p36_p13 = scmp.eq.s32.totalorder %s35_s10, 0 }
  0x33   : > { %p46_p0 = scmp.eq.s32.totalorder %s3633_s27, 0  ;;  %p3125_p10 = scmp.lt.s32.totalorder %s3633_s27, 2 }
  0x34   : > { %p3776_p5 = por %p185_p2, %p45_p12  ;;  %s3785_s13 = sand.u32 1, %s3629_s26  }
  0x35   : > { %s3782_s12 = scalar_select %p36_p13, %s3629_s26, %s38_s29  }
  0x36   : > { %3108 = dma.hbm_to_vmem [thread:$0]  (!%p3737_p11), %s4706_s3, 1024, %s250_s14, [#allocation9], %s4687_s16, %s4687_s16, %s4689_s17  }
  0x37   : > { %s4707_s11 = scalar_select %p3776_p5, 1, 0 }
  0x38   : > { %4708 = sst [smem:[#allocation20_spill]] %s3782_s12  ;;  %p47_p3 = por %p46_p0, %p45_p12 }
  0x39   : > { %s2843_s14 = sshll.u32 %s3785_s13, 8  ;;  %s2917_s15 = sshll.u32 %s3633_s27, 12 }
  0x3a   : > { %s4709_s0 = sld [smem:[#allocation22_spill]]  ;;  %s273_s21 = scalar_lea.vmem [#allocation2], %s2843_s14 }
  0x3b   : > { %s281_s22 = sshll.u32 %s273_s21, 4  ;;  %p3796_p2 = pnand %p3125_p10, %p47_p3  ;;  %s3794_s22 = int_to_ptr.vmem [resolvable:$true] %s281_s22 }
  0x3c   : > { %s270_s17 = scalar_lea.sflag [#allocation3], %s3785_s13 }
  0x3d   : > { %p3473_p7 = pneg %p3796_p2 }
  0x40   : > { %s3792_s20 = scalar_lea.hbm %s4709_s0, %s2917_s15  ;;  %s3476_s18 = scalar_lea.hbm %s4709_s0, 8192 }
  0x41   : > { %s3471_s2 = scalar_lea.hbm %s3792_s20, 4096  ;;  %p3477_p13 = scmp.lt.s32.totalorder %s3792_s20, %s4709_s0 }
  0x42   : > { %p3472_p11 = scmp.ne.s32.totalorder %s3792_s20, %s3471_s2  ;;  %p3478_p0 = scmp.lt.s32.totalorder %s3476_s18, %s3471_s2 }
  0x44   : > { %p3474_p9 = pnand %p3473_p7, %p3472_p11  ;;  %p3479_p10 = por %p3478_p0, %p3477_p13 }
  0x46   : > { %p3475_p12 = pneg %p3474_p9 }
  0x48   : > { %p3480_p3 = pnand %p3479_p10, %p3475_p12 }
  0x4a   : > { %3483 = shalt.err (!%p3480_p3)
}
  0x4b   : > { %s3484_s10 = scalar_lea.vmem %s3794_s22, 4096  ;;  %s3639_s14 = smov [#allocation2]  }
  0x4c   : > { %p3485_p1 = scmp.ne.s32.totalorder %s3794_s22, %s3484_s10  ;;  %s3489_s15 = sshll.u32 %s3639_s14, 4  ;;  %s3490_s15 = int_to_ptr.vmem [resolvable:$false] %s3489_s15 }
  0x4d   : > { %s3491_s16 = scalar_lea.vmem %s3490_s15, 8192  ;;  %p3492_p6 = scmp.lt.s32.totalorder %s3794_s22, %s3490_s15 }
  0x4e   : > { %p3487_p11 = pnand %p3485_p1, %p3473_p7  ;;  %p3493_p5 = scmp.lt.s32.totalorder %s3491_s16, %s3484_s10 }
  0x50   : > { %p3488_p9 = pneg %p3487_p11  ;;  %p3494_p4 = por %p3493_p5, %p3492_p6 }
  0x52   : > { %p3495_p13 = pnand %p3494_p4, %p3488_p9 }
  0x54   : > { %3498 = shalt.err (!%p3495_p13)
}
  0x55   : > { %s4711_s2 = smov 4   ;;  %s4712_s18 = smov 64  }
  0x56   : > { %3112 = dma.hbm_to_vmem [thread:$0]  (!%p3796_p2), %s3792_s20, 4096, %s3794_s22, %s270_s17, %s4712_s18, %s4712_s18, %s4711_s2  }
  0x57   : > { %s2918_s19 = sshll.u32 %s3633_s27, 7  ;;  %s4713_s14 = sshll.u32 %s3785_s13, 3 }
  0x58   : > { %s3836_s10 = scalar_lea.hbm %s4680_s1, %s2918_s19  ;;  %s295_s15 = scalar_lea.vmem [#allocation5], %s4713_s14 }
  0x59   : > { %s302_s0 = sshll.u32 %s295_s15, 4  ;;  %s4714_s3 = sand.u32 1, %s3633_s27   ;;  %s3840_s0 = int_to_ptr.vmem [resolvable:$true] %s302_s0 }
  0x5a   : > { %s292_s12 = scalar_lea.sflag [#allocation6], %s4714_s3  ;;  %s3499_s26 = scalar_lea.hbm %s3836_s10, 128 }
  0x5b   : > { %p3500_p1 = scmp.ne.s32.totalorder %s3836_s10, %s3499_s26  ;;  %s3504_s22 = scalar_lea.hbm %s4680_s1, 256 }
  0x5c   : > { %p3505_p5 = scmp.lt.s32.totalorder %s3836_s10, %s4680_s1  ;;  %p3506_p12 = scmp.lt.s32.totalorder %s3504_s22, %s3499_s26 }
  0x5d   : > { %p3502_p4 = pnand %p3500_p1, %p3473_p7 }
  0x5e   : > { %p3507_p0 = por %p3506_p12, %p3505_p5 }
  0x5f   : > { %p3503_p6 = pneg %p3502_p4 }
  0x61   : > { %p3508_p10 = pnand %p3507_p0, %p3503_p6 }
  0x63   : > { %3511 = shalt.err (!%p3508_p10)
}
  0x64   : > { %s3512_s3 = scalar_lea.vmem %s3840_s0, 128  ;;  %s3640_s21 = smov [#allocation5]  }
  0x65   : > { %p3513_p3 = scmp.ne.s32.totalorder %s3840_s0, %s3512_s3  ;;  %s3517_s16 = sshll.u32 %s3640_s21, 4  ;;  %s3518_s16 = int_to_ptr.vmem [resolvable:$false] %s3517_s16 }
  0x66   : > { %s3519_s14 = scalar_lea.vmem %s3518_s16, 256  ;;  %p3520_p13 = scmp.lt.s32.totalorder %s3840_s0, %s3518_s16 }
  0x67   : > { %p3515_p11 = pnand %p3513_p3, %p3473_p7  ;;  %p3521_p1 = scmp.lt.s32.totalorder %s3519_s14, %s3512_s3 }
  0x69   : > { %p3516_p9 = pneg %p3515_p11  ;;  %p3522_p4 = por %p3521_p1, %p3520_p13 }
  0x6b   : > { %p3523_p5 = pnand %p3522_p4, %p3516_p9 }
  0x6d   : > { %3526 = shalt.err (!%p3523_p5)
}
  0x6e   : > { %3115 = dma.hbm_to_vmem [thread:$0]  (!%p3796_p2), %s3836_s10, 128, %s3840_s0, %s292_s12, %s4712_s18, %s4712_s18, %s4711_s2  }
  0x6f   : > { %314 = sbr.rel (%p3728_p8) target bundleno = 1250 (0x4e2), region = 44 }
  0x74   : > { %s3872_s26 = sand.u32 1, %s3625_s25   ;;  %p4715_p7 = scmp.ne.s32.totalorder %s4701_s30, 0 }
  0x75   : > { %s2851_s15 = sshll.u32 %s3872_s26, 8  ;;  %s317_s17 = scalar_lea.sflag [#allocation3], %s3872_s26 }
  0x76   : > { %s3876_s20 = scalar_lea.vmem [#allocation2], %s2851_s15 }
  0x77   : > { %3596 = dma.done.wait (%p4715_p7), %s317_s17, 4096  }
  0x78   : > { %3598 = vsyncadd (%p4715_p7), %s317_s17, 4294963200  ;;  %s325_s0 = sand.u32 1, %s3709_s28   ;;  %s2852_s9 = sshll.u32 %s3872_s26, 3 }
  0x79   : > { %s326_s12 = scalar_lea.sflag [#allocation6], %s325_s0  ;;  %s3884_s29 = scalar_lea.vmem [#allocation5], %s2852_s9 }
  0x7a   : > { %3600 = dma.done.wait (%p4715_p7), %s326_s12, 128  }
  0x7b   : > { %3602 = vsyncadd (%p4715_p7), %s326_s12, 4294967168  ;;  %p4716_p8 = scmp.eq.s32.totalorder %s3709_s28, 0 }
  0x7d   : > { %3604 = dma.done.wait (%p4716_p8), [#allocation6], 1024   ;;  %p4717_p2 = pmov %p4716_p8 }
  0x7f   : > { %3606 = vsyncadd (%p4717_p2), [#allocation6], 4294966272  ;;  %p4718_p6 = pmov %p4717_p2 }
  0x80   : > { %p4719_p12 = pmov %p4717_p2 }
  0x81   : > { %3608 = dma.done.wait (%p4718_p6), [#allocation9], 1024  }
  0x82   : > { %3610 = vsyncadd (%p4719_p12), [#allocation9], 4294966272  ;;  %v3641_v0 = vmov 0.0   ;;  %vm3642_vm0 = vmmov 0   ;;  %v3170_v1 = vld [vmem:[#allocation7 + $0x38] sm:$0xff]   ;;  %v3172_v3 = vld [vmem:[#allocation7 + $0x30] sm:$0xff]   ;;  %v1118_v52 = vlaneseq }
  0x83   : > { %2970 = vmatprep.subr.bf16.mxu0 %v3641_v0  ;;  %2986 = vmatprep.mubr.msk.bf16.mxu0 %vm3642_vm0, %v3641_v0  ;;  %v3171_v2 = vld [vmem:[#allocation8 + $0x38] sm:$0xff]   ;;  %v3173_v4 = vld [vmem:[#allocation8 + $0x30] sm:$0xff]   ;;  %v3175_v5 = vld [vmem:[#allocation8 + $0x28] sm:$0xff]   ;;  %v3643_v50 = vmov 1966171168   ;;  %vm1695_vm1 = vcmask 130112  }
  0x84   : > { %2971 = vmatpush3.bf16.msra.mxu0 %v3170_v1  ;;  %3070 = vmatprep.subr.bf16.mxu1 %v3171_v2  ;;  %v3174_v6 = vld [vmem:[#allocation7 + $0x28] sm:$0xff]   ;;  %v3177_v7 = vld [vmem:[#allocation8 + $0x20] sm:$0xff]   ;;  %v3179_v9 = vld [vmem:[#allocation8 + $0x18] sm:$0xff]   ;;  %v1116_v51 = vunpack.c.l.s4 %v3643_v50  ;;  %v3935_v55 = vshrl.u32 %v1118_v52, 7  ;;  %vm1702_vm2 = vcmask 195712   ;;  %vm1709_vm3 = vcmask 261312  }
  0x85   : > { %2972 = vmatprep.subr.bf16.mxu0 %v3641_v0  ;;  %3078 = vmatpush3.bf16.msra.mxu1 %v3171_v2  ;;  %v3176_v8 = vld [vmem:[#allocation7 + $0x20] sm:$0xff]   ;;  %v3178_v10 = vld [vmem:[#allocation7 + $0x18] sm:$0xff]   ;;  %v3181_v11 = vld [vmem:[#allocation8 + $0x10] sm:$0xff]   ;;  %vm1996_vm4 = vcmask 1041409   ;;  %vm1998_vm5 = vcmask 1042434   ;;  %vm2000_vm6 = vcmask 1043459  }
  0x86   : > { %3071 = vmatprep.subr.bf16.mxu1 %v3173_v4  ;;  %v407_v12 = vld [vmem:[%s3876_s20 + $0x60] sm:$0xff]   ;;  %v3183_v14 = vld [vmem:[#allocation8 + $0x8] sm:$0xff]   ;;  %v3185_v16 = vld [vmem:[#allocation8] sm:$0xff]   ;;  %v1117_v54 = vunpack.c.0.s8 %v1116_v51  ;;  %vm2002_vm7 = vcmask 1044484   ;;  %vm2004_vm8 = vcmask 1045509   ;;  %vm2008_vm9 = vcmask 1047559  }
  0x87   : > { %v3180_v13 = vld [vmem:[#allocation7 + $0x10] sm:$0xff]   ;;  %3030 = vmatprep.mubr.bf16.mxu1 %v407_v12  ;;  %v3182_v15 = vld [vmem:[#allocation7 + $0x8] sm:$0xff]   ;;  %v3184_v17 = vld [vmem:[#allocation7] sm:$0xff]   ;;  %vm2006_vm11 = vcmask 1046534   ;;  %vm2021_vm12 = vcmask 261120   ;;  %s2855_s22 = sshll.u32 %s3872_s26, 4 }
  0x88   : > { %2973 = vmatpush3.bf16.msra.mxu0 %v3172_v3  ;;  %v383_v18 = vld [vmem:[%s3876_s20] sm:$0xff]   ;;  %v409_v19 = vld [vmem:[%s3876_s20 + $0x68] sm:$0xff]   ;;  %v411_v21 = vld [vmem:[%s3876_s20 + $0x70] sm:$0xff]   ;;  %v3938_v61 = vsub.s32 %v1117_v54, %v3935_v55  ;;  %s4428_s13 = scalar_lea.vmem [#allocation11], %s2855_s22  ;;  %s2919_s19 = sshll.u32 %s3709_s28, 8 }
  0x89   : > { %2974 = vmatprep.subr.bf16.mxu0 %v3641_v0  ;;  %3079 = vmatpush3.bf16.msra.mxu1 %v3173_v4  ;;  %v3186_v20 = vld [vmem:[%s3884_s29] sm:$0xff]   ;;  %v413_v22 = vld [vmem:[%s3876_s20 + $0x78] sm:$0xff]   ;;  %v419_v25 = vld [vmem:[%s3876_s20 + $0x90] sm:$0xff]   ;;  %s4506_s16 = scalar_lea.hbm %s4686_s7, %s2919_s19  ;;  %s2691_s14 = sshll.u32 %s4428_s13, 4  ;;  %s4509_s14 = int_to_ptr.vmem [resolvable:$true] %s2691_s14 }
  0x8a   : > { %3072 = vmatprep.subr.bf16.mxu1 %v3175_v5  ;;  %v415_v23 = vld [vmem:[%s3876_s20 + $0x80] sm:$0xff]   ;;  %v417_v24 = vld [vmem:[%s3876_s20 + $0x88] sm:$0xff]   ;;  %v421_v26 = vld [vmem:[%s3876_s20 + $0x98] sm:$0xff]   ;;  %s2662_s15 = scalar_lea.sflag [#allocation12], %s3872_s26  ;;  %s3527_s17 = scalar_lea.vmem %s4509_s14, 256 }
  0x8b   : > { %v423_v27 = vld [vmem:[%s3876_s20 + $0xa0] sm:$0xff]   ;;  %v385_v28 = vld [vmem:[%s3876_s20 + $0x8] sm:$0xff]   ;;  %v387_v29 = vld [vmem:[%s3876_s20 + $0x10] sm:$0xff]   ;;  %p3528_p0 = scmp.ne.s32.totalorder %s4509_s14, %s3527_s17  ;;  %p4722_p10 = scmp.ne.s32.totalorder %s4707_s11, 0 }
  0x8c   : > { %2975 = vmatpush3.bf16.msra.mxu0 %v3174_v6  ;;  %v425_v30 = vld [vmem:[%s3876_s20 + $0xa8] sm:$0xff]   ;;  %v427_v31 = vld [vmem:[%s3876_s20 + $0xb0] sm:$0xff]   ;;  %v389_v32 = vld [vmem:[%s3876_s20 + $0x18] sm:$0xff]   ;;  %s3644_s0 = smov [#allocation11]  }
  0x8d   : > { %2976 = vmatprep.subr.bf16.mxu0 %v3641_v0  ;;  %3080 = vmatpush3.bf16.msra.mxu1 %v3175_v5  ;;  %v391_v33 = vld [vmem:[%s3876_s20 + $0x20] sm:$0xff]   ;;  %v429_v34 = vld [vmem:[%s3876_s20 + $0xb8] sm:$0xff]   ;;  %v393_v36 = vld [vmem:[%s3876_s20 + $0x28] sm:$0xff]   ;;  %p3529_p3 = pnand %p3528_p0, %p4722_p10  ;;  %s3531_s9 = sshll.u32 %s3644_s0, 4  ;;  %s3532_s9 = int_to_ptr.vmem [resolvable:$false] %s3531_s9 }
  0x8e   : > { %3073 = vmatprep.subr.bf16.mxu1 %v3177_v7  ;;  %v431_v35 = vld [vmem:[%s3876_s20 + $0xc0] sm:$0xff]   ;;  %v395_v37 = vld [vmem:[%s3876_s20 + $0x30] sm:$0xff]   ;;  %v433_v38 = vld [vmem:[%s3876_s20 + $0xc8] sm:$0xff]   ;;  %s3533_s12 = scalar_lea.vmem %s3532_s9, 512  ;;  %p3534_p9 = scmp.lt.s32.totalorder %s4509_s14, %s3532_s9 }
  0x8f   : > { %v435_v39 = vld [vmem:[%s3876_s20 + $0xd0] sm:$0xff]   ;;  %v397_v40 = vld [vmem:[%s3876_s20 + $0x38] sm:$0xff]   ;;  %v399_v41 = vld [vmem:[%s3876_s20 + $0x40] sm:$0xff]   ;;  %p3530_p11 = pneg %p3529_p3  ;;  %p3535_p13 = scmp.lt.s32.totalorder %s3533_s12, %s3527_s17 }
  0x90   : > { %2977 = vmatpush3.bf16.msra.mxu0 %v3176_v8  ;;  %v437_v42 = vld [vmem:[%s3876_s20 + $0xd8] sm:$0xff]   ;;  %v439_v43 = vld [vmem:[%s3876_s20 + $0xe0] sm:$0xff]   ;;  %v401_v44 = vld [vmem:[%s3876_s20 + $0x48] sm:$0xff]  }
  0x91   : > { %2978 = vmatprep.subr.bf16.mxu0 %v3641_v0  ;;  %3081 = vmatpush3.bf16.msra.mxu1 %v3177_v7  ;;  %v403_v45 = vld [vmem:[%s3876_s20 + $0x50] sm:$0xff]   ;;  %v441_v46 = vld [vmem:[%s3876_s20 + $0xe8] sm:$0xff]   ;;  %v405_v48 = vld [vmem:[%s3876_s20 + $0x58] sm:$0xff]   ;;  %p3536_p1 = por %p3535_p13, %p3534_p9 }
  0x92   : > { %3074 = vmatprep.subr.bf16.mxu1 %v3179_v9  ;;  %v443_v47 = vld [vmem:[%s3876_s20 + $0xf0] sm:$0xff]   ;;  %v445_v49 = vld [vmem:[%s3876_s20 + $0xf8] sm:$0xff]   ;;  %v2857_v53 = vld [vmem:[%s4683_s4] ss:$0 sm:$0xff] }
  0x93   : > { %p3537_p4 = pnand %p3536_p1, %p3530_p11 }
  0x94   : > { %2979 = vmatpush3.bf16.msra.mxu0 %v3178_v10 }
  0x95   : > { %2980 = vmatprep.subr.bf16.mxu0 %v3641_v0  ;;  %3082 = vmatpush3.bf16.msra.mxu1 %v3179_v9 }
  0x96   : > { %3075 = vmatprep.subr.bf16.mxu1 %v3181_v11 }
  0x98   : > { %2981 = vmatpush3.bf16.msra.mxu0 %v3180_v13 }
  0x99   : > { %2982 = vmatprep.subr.bf16.mxu0 %v3641_v0  ;;  %3083 = vmatpush3.bf16.msra.mxu1 %v3181_v11 }
  0x9a   : > { %3076 = vmatprep.subr.bf16.mxu1 %v3183_v14 }
  0x9c   : > { %2983 = vmatpush3.bf16.msra.mxu0 %v3182_v15 }
  0x9d   : > { %2984 = vmatprep.subr.bf16.mxu0 %v3641_v0  ;;  %3084 = vmatpush3.bf16.msra.mxu1 %v3183_v14 }
  0x9e   : > { %3077 = vmatprep.subr.bf16.mxu1 %v3185_v16 }
  0xa0   : > { %2985 = vmatpush3.bf16.msra.mxu0 %v3184_v17 }
  0xa1   : > { %2990 = vmatprep.subr.bf16.mxu0 %v3171_v2  ;;  %3085 = vmatpush3.bf16.msra.mxu1 %v3185_v16 }
  0xa3   : > { %2987 = vmatmul.mubr.bf16.vlgmr.msra.gmra.mxu0 %v3186_v20 }
  0xa4   : > { %2991 = vmatpush3.bf16.msra.mxu0 %v3171_v2  ;;  %3006 = vmatprep.mubr.bf16.mxu0 %v383_v18 }
  0xa5   : > { %3031 = vmatmul.mubr.bf16.vlgmr.msra.gmra.mxu1 %v409_v19  ;;  %2992 = vmatprep.subr.bf16.mxu0 %v3173_v4 }
  0xa6   : > { %3034 = vmatprep.mubr.bf16.mxu1 %v411_v21 }
  0xa8   : > { %2993 = vmatpush3.bf16.msra.mxu0 %v3173_v4 }
  0xa9   : > { %2994 = vmatprep.subr.bf16.mxu0 %v3175_v5 }
  0xac   : > { %2995 = vmatpush3.bf16.msra.mxu0 %v3175_v5 }
  0xad   : > { %3035 = vmatmul.mubr.bf16.gmra.mxu1 %v413_v22  ;;  %2996 = vmatprep.subr.bf16.mxu0 %v3177_v7 }
  0xae   : > { %3038 = vmatprep.mubr.bf16.mxu1 %v415_v23 }
  0xb0   : > { %2997 = vmatpush3.bf16.msra.mxu0 %v3177_v7 }
  0xb1   : > { %2998 = vmatprep.subr.bf16.mxu0 %v3179_v9 }
  0xb4   : > { %2999 = vmatpush3.bf16.msra.mxu0 %v3179_v9  ;;  %v3952_v9 = vsub.s32 0, %v3935_v55 }
  0xb5   : > { %3039 = vmatmul.mubr.bf16.gmra.mxu1 %v417_v24  ;;  %3000 = vmatprep.subr.bf16.mxu0 %v3181_v11 }
  0xb6   : > { %3042 = vmatprep.mubr.bf16.mxu1 %v419_v25  ;;  %4720 = vst [vmem:[#allocation21_spill] sm:$0xff] %v3952_v9 }
  0xb8   : > { %3001 = vmatpush3.bf16.msra.mxu0 %v3181_v11 }
  0xb9   : > { %3002 = vmatprep.subr.bf16.mxu0 %v3183_v14 }
  0xbc   : > { %3003 = vmatpush3.bf16.msra.mxu0 %v3183_v14 }
  0xbd   : > { %3043 = vmatmul.mubr.bf16.gmra.mxu1 %v421_v26  ;;  %3004 = vmatprep.subr.bf16.mxu0 %v3185_v16 }
  0xbe   : > { %3046 = vmatprep.mubr.bf16.mxu1 %v423_v27 }
  0xc0   : > { %3005 = vmatpush3.bf16.msra.mxu0 %v3185_v16 }
  0xc3   : > { %3007 = vmatmul.mubr.bf16.vlgmr.msra.gmra.mxu0 %v385_v28 }
  0xc4   : > { %3010 = vmatprep.mubr.bf16.mxu0 %v387_v29 }
  0xc5   : > { %3047 = vmatmul.mubr.bf16.gmra.mxu1 %v425_v30 }
  0xc6   : > { %3050 = vmatprep.mubr.bf16.mxu1 %v427_v31 }
  0xcb   : > { %3011 = vmatmul.mubr.bf16.gmra.mxu0 %v389_v32 }
  0xcc   : > { %3014 = vmatprep.mubr.bf16.mxu0 %v391_v33 }
  0xcd   : > { %3051 = vmatmul.mubr.bf16.gmra.mxu1 %v429_v34 }
  0xce   : > { %3054 = vmatprep.mubr.bf16.mxu1 %v431_v35 }
  0xd3   : > { %3015 = vmatmul.mubr.bf16.gmra.mxu0 %v393_v36 }
  0xd4   : > { %3018 = vmatprep.mubr.bf16.mxu0 %v395_v37  ;;  %v3973_v37 = vld [vmem:[%s4684_s5] ss:$0 sm:$0xff] }
  0xd5   : > { %3055 = vmatmul.mubr.bf16.gmra.mxu1 %v433_v38 }
  0xd6   : > { %3058 = vmatprep.mubr.bf16.mxu1 %v435_v39 }
  0xdb   : > { %3019 = vmatmul.mubr.bf16.gmra.mxu0 %v397_v40 }
  0xdc   : > { %3022 = vmatprep.mubr.bf16.mxu0 %v399_v41 }
  0xdd   : > { %3059 = vmatmul.mubr.bf16.gmra.mxu1 %v437_v42 }
  0xde   : > { %3062 = vmatprep.mubr.bf16.mxu1 %v439_v43 }
  0xe3   : > { %3023 = vmatmul.mubr.bf16.gmra.mxu0 %v401_v44 }
  0xe4   : > { %3026 = vmatprep.mubr.bf16.mxu0 %v403_v45 }
  0xe5   : > { %3063 = vmatmul.mubr.bf16.gmra.mxu1 %v441_v46 }
  0xe6   : > { %3066 = vmatprep.mubr.bf16.mxu1 %v443_v47 }
  0xeb   : > { %3027 = vmatmul.mubr.bf16.gmra.mxu0 %v405_v48 }
  0xed   : > { %3067 = vmatmul.mubr.bf16.gmra.mxu1 %v445_v49 }
 0x163   : > { %v560_v56 = vpop.f32.mrf.mxu0 }
 0x164   : > { %v561_v57 = vadd.f32 %v2857_v53, %v560_v56 }
 0x165   : > { %v3032_v58 = vpop.f32.mrf.mxu1  ;;  %v2988_v59 = vpop.f32.mrf.mxu0 }
 0x166   : > { %v1114_v60 = vcombine.high %v561_v57, %v561_v57  ;;  %v1121_v38 = vrot.slane %v561_v57, %v3938_v61 }
 0x167   : > { %v953_v62 = vpop.f32.mrf.mxu1  ;;  %v563_v63 = vpop.f32.mrf.mxu0 }
 0x168   : > { %v1128_v0 = vrot.slane %v1114_v60, %v3938_v61  ;;  %v3944_v5 = vadd.f32 %v2857_v53, %v563_v63  ;;  %v3980_v48 = vrot.slane %v1121_v38, %v3938_v61 }
 0x169   : > { %v3033_v1 = vpop.f32.mrf.mxu1  ;;  %v2989_v2 = vpop.f32.mrf.mxu0 }
 0x16a   : > { %v1130_v3 = vcombine.high %v1128_v0, %v1128_v0  ;;  %v3942_v4 = vrot.slane %v1128_v0, %v3938_v61  ;;  %v1170_v13 = vrot.slane %v3944_v5, %v3938_v61  ;;  %v3986_v60 = vrot.slane %v3980_v48, %v3952_v9 }
 0x16b   : > { %v956_v6 = vpop.f32.mrf.mxu1 }
 0x16c   : > { %v3947_v7 = vrot.slane %v1130_v3, %v3938_v61  ;;  %v1160_v8 = vcombine.high %v3942_v4, %v3942_v4  ;;  %v3961_v21 = vrot.slane %v1170_v13, %v3938_v61  ;;  %v1178_v26 = vcombine.high %v1170_v13, %v1170_v13 }
 0x16d   : > { %v3036_v10 = vpop.f32.mrf.mxu1 }
 0x16e   : > { %v1239_v11 = vrot.slane %v1160_v8, %v3952_v9  ;;  %v1162_v12 = vcombine.high %v3947_v7, %v3947_v7  ;;  %v1247_v27 = vrot.slane %v3961_v21, %v3952_v9  ;;  %v3968_v32 = vrot.slane %v1178_v26, %v3938_v61 }
 0x16f   : > { %v969_v14 = vpop.f32.mrf.mxu1  ;;  %v1208_v3 = vcombine.high %v3961_v21, %v3961_v21 }
 0x170   : > { %v1316_v15 = vadd.f32 %v1239_v11, %v953_v62  ;;  %v1319_v16 = vadd.f32 %v3033_v1, %v1239_v11  ;;  %v1317_v17 = vadd.f32 %v1239_v11, %v956_v6  ;;  %v1243_v19 = vrot.slane %v1162_v12, %v3952_v9 }
 0x171   : > { %v3037_v18 = vpop.f32.mrf.mxu1  ;;  %v1318_v20 = vadd.f32 %v3032_v58, %v1239_v11  ;;  %v1251_v40 = vrot.slane %v3968_v32, %v3952_v9 }
 0x172   : > { %3251 = vtanh.f32 %v1316_v15  ;;  %v3963_v23 = vadd.f32 %v3037_v18, %v1243_v19  ;;  %v1320_v24 = vadd.f32 %v1243_v19, %v969_v14  ;;  %v1322_v28 = vadd.f32 %v3036_v10, %v1243_v19 }
 0x173   : > { %v972_v22 = vpop.f32.mrf.mxu1  ;;  %3253 = vtanh.f32 %v1319_v16  ;;  %v1129_v14 = vcombine.high %v1121_v38, %v1121_v38  ;;  %v1210_v38 = vcombine.high %v3968_v32, %v3968_v32 }
 0x174   : > { %3255 = vtanh.f32 %v1317_v17  ;;  %v1321_v33 = vadd.f32 %v1243_v19, %v972_v22  ;;  %v1255_v17 = vrot.slane %v1208_v3, %v3952_v9 }
 0x175   : > { %v3040_v25 = vpop.f32.mrf.mxu1  ;;  %3257 = vtanh.f32 %v1318_v20 }
 0x176   : > { %3259 = vtanh.f32 %v1320_v24  ;;  %v1326_v30 = vadd.f32 %v3040_v25, %v1247_v27  ;;  %v3999_v25 = vrot.slane %v1129_v14, %v3938_v61 }
 0x177   : > { %v985_v29 = vpop.f32.mrf.mxu1  ;;  %3261 = vtanh.f32 %v1322_v28 }
 0x178   : > { %3263 = vtanh.f32 %v1326_v30  ;;  %v1324_v35 = vadd.f32 %v1247_v27, %v985_v29 }
 0x179   : > { %v3041_v31 = vpop.f32.mrf.mxu1  ;;  %3265 = vtanh.f32 %v1321_v33 }
 0x17a   : > { %v1327_v39 = vadd.f32 %v3041_v31, %v1247_v27  ;;  %3267 = vtanh.f32 %v1324_v35 }
 0x17b   : > { %v988_v34 = vpop.f32.mrf.mxu1 }
 0x17c   : > { %3269 = vtanh.f32 %v1327_v39  ;;  %v1325_v49 = vadd.f32 %v1247_v27, %v988_v34 }
 0x17d   : > { %v3044_v36 = vpop.f32.mrf.mxu1 }
 0x17e   : > { %v1330_v62 = vadd.f32 %v3044_v36, %v1251_v40  ;;  %v1219_v36 = vrot.slane %v3999_v25, %v3952_v9 }
 0x17f   : > { %v1001_v41 = vpop.f32.mrf.mxu1  ;;  %v3252_v42 = vpop.eup %3251 }
 0x180   : > { %v3254_v43 = vpop.eup %3253  ;;  %v1328_v44 = vadd.f32 %v1251_v40, %v1001_v41  ;;  %v1451_v46 = vmul.f32 %v3252_v42, %v3973_v37 }
 0x181   : > { %v3045_v45 = vpop.f32.mrf.mxu1  ;;  %v3256_v47 = vpop.eup %3255  ;;  %v1454_v58 = vmul.f32 %v3254_v43, %v3973_v37 }
 0x182   : > { %1539 = vadd.xlane.f32.xlu0 %v1451_v46  ;;  %v1452_v50 = vmul.f32 %v3256_v47, %v3973_v37  ;;  %v3258_v53 = vpop.eup %3257  ;;  %3271 = vtanh.f32 %v1328_v44  ;;  %v1331_v56 = vadd.f32 %v3045_v45, %v1251_v40 }
 0x183   : > { %v1004_v51 = vpop.f32.mrf.mxu1  ;;  %v3008_v54 = vpop.f32.mrf.mxu0  ;;  %3273 = vtanh.f32 %v1325_v49  ;;  %v1453_v63 = vmul.f32 %v3258_v53, %v3973_v37  ;;  %v1259_v49 = vrot.slane %v1210_v38, %v3952_v9 }
 0x184   : > { %1541 = vadd.xlane.f32.xlu1 %v1452_v50  ;;  %v3260_v59 = vpop.eup %3259  ;;  %3275 = vtanh.f32 %v1331_v56  ;;  %v1294_v6 = vadd.f32 %v3008_v54, %v3986_v60  ;;  %v1329_v11 = vadd.f32 %v1251_v40, %v1004_v51 }
 0x185   : > { %v3048_v57 = vpop.f32.mrf.mxu1  ;;  %v3262_v0 = vpop.eup %3261  ;;  %v1455_v8 = vmul.f32 %v3260_v59, %v3973_v37  ;;  %3277 = vtanh.f32 %v1330_v62 }
 0x186   : > { %1545 = vadd.xlane.f32.xlu0 %v1454_v58  ;;  %v857_v1 = vpop.f32.mrf.mxu0  ;;  %v3264_v10 = vpop.eup %3263  ;;  %v1457_v12 = vmul.f32 %v3262_v0, %v3973_v37  ;;  %3279 = vtanh.f32 %v1294_v6  ;;  %v1334_v21 = vadd.f32 %v3048_v57, %v1255_v17  ;;  %v1163_v6 = vcombine.high %v3944_v5, %v3944_v5 }
 0x187   : > { %v1017_v2 = vpop.f32.mrf.mxu1  ;;  %v3266_v13 = vpop.eup %3265  ;;  %v1292_v18 = vadd.f32 %v3986_v60, %v857_v1  ;;  %v1461_v19 = vmul.f32 %v3264_v10, %v3973_v37  ;;  %3281 = vtanh.f32 %v1329_v11 }
 0x188   : > { %1543 = vadd.xlane.f32.xlu1 %v1453_v63  ;;  %v3009_v15 = vpop.f32.mrf.mxu0  ;;  %v3268_v20 = vpop.eup %3267  ;;  %v1456_v22 = vmul.f32 %v3266_v13, %v3973_v37  ;;  %v1332_v28 = vadd.f32 %v1255_v17, %v1017_v2 }
 0x189   : > { %v3049_v16 = vpop.f32.mrf.mxu1  ;;  %v3270_v24 = vpop.eup %3269  ;;  %3283 = vtanh.f32 %v1292_v18  ;;  %v1459_v29 = vmul.f32 %v3268_v20, %v3973_v37  ;;  %v1295_v39 = vadd.f32 %v3009_v15, %v3986_v60 }
 0x18a   : > { %1547 = vadd.xlane.f32.xlu0 %v1455_v8  ;;  %v860_v26 = vpop.f32.mrf.mxu0  ;;  %3285 = vtanh.f32 %v1334_v21  ;;  %v1462_v33 = vmul.f32 %v3270_v24, %v3973_v37  ;;  %v1335_v47 = vadd.f32 %v3049_v16, %v1255_v17 }
 0x18b   : > { %v1020_v27 = vpop.f32.mrf.mxu1  ;;  %3287 = vtanh.f32 %v1332_v28  ;;  %v1293_v58 = vadd.f32 %v3986_v60, %v860_v26 }
 0x18c   : > { %1551 = vadd.xlane.f32.xlu1 %v1457_v12  ;;  %v1333_v31 = vadd.f32 %v1255_v17, %v1020_v27  ;;  %v3012_v35 = vpop.f32.mrf.mxu0  ;;  %v1159_v12 = vcombine.high %v3980_v48, %v3980_v48  ;;  %v1177_v17 = vrot.slane %v1163_v6, %v3938_v61 }
 0x18d   : > { %v3052_v42 = vpop.f32.mrf.mxu1  ;;  %v1298_v43 = vadd.f32 %v3012_v35, %v1219_v36 }
 0x18e   : > { %1559 = vadd.xlane.f32.xlu0 %v1461_v19  ;;  %3289 = vtanh.f32 %v1333_v31  ;;  %v873_v46 = vpop.f32.mrf.mxu0  ;;  %v1338_v53 = vadd.f32 %v3052_v42, %v1259_v49  ;;  %v1223_v48 = vrot.slane %v1159_v12, %v3952_v9  ;;  %v4027_v27 = vrot.slane %v1177_v17, %v3938_v61 }
 0x18f   : > { %v3272_v30 = vpop.eup %3271  ;;  %3291 = vtanh.f32 %v1295_v39  ;;  %v1033_v51 = vpop.f32.mrf.mxu1  ;;  %v1296_v0 = vadd.f32 %v1219_v36, %v873_v46 }
 0x190   : > { %1549 = vadd.xlane.f32.xlu1 %v1456_v22  ;;  %v3274_v34 = vpop.eup %3273  ;;  %v1463_v40 = vmul.f32 %v3272_v30, %v3973_v37  ;;  %3293 = vtanh.f32 %v1298_v43  ;;  %v3013_v57 = vpop.f32.mrf.mxu0  ;;  %v1336_v8 = vadd.f32 %v1259_v49, %v1033_v51  ;;  %v1263_v38 = vrot.slane %v4027_v27, %v3952_v9 }
 0x191   : > { %v3276_v41 = vpop.eup %3275  ;;  %v1460_v44 = vmul.f32 %v3274_v34, %v3973_v37  ;;  %3295 = vtanh.f32 %v1335_v47  ;;  %v3053_v63 = vpop.f32.mrf.mxu1  ;;  %v1299_v13 = vadd.f32 %v3013_v57, %v1219_v36  ;;  %v1179_v51 = vcombine.high %v1177_v17, %v1177_v17 }
 0x192   : > { %1555 = vadd.xlane.f32.xlu0 %v1459_v29  ;;  %v3278_v45 = vpop.eup %3277  ;;  %v1466_v32 = vmul.f32 %v3276_v41, %v3973_v37  ;;  %3297 = vtanh.f32 %v1338_v53  ;;  %v876_v3 = vpop.f32.mrf.mxu0  ;;  %v1339_v5 = vadd.f32 %v3053_v63, %v1259_v49 }
 0x193   : > { %v3280_v50 = vpop.eup %3279  ;;  %v1465_v54 = vmul.f32 %v3278_v45, %v3973_v37  ;;  %3299 = vtanh.f32 %v1293_v58  ;;  %v1036_v11 = vpop.f32.mrf.mxu1  ;;  %v1297_v21 = vadd.f32 %v1219_v36, %v876_v3  ;;  %v1161_v58 = vcombine.high %v3999_v25, %v3999_v25 }
 0x194   : > { %1561 = vadd.xlane.f32.xlu1 %v1462_v33  ;;  %v3282_v56 = vpop.eup %3281  ;;  %v1429_v59 = vmul.f32 %v3280_v50, %v3973_v37  ;;  %3301 = vtanh.f32 %v1296_v0  ;;  %v3016_v16 = vpop.f32.mrf.mxu0  ;;  %v1337_v33 = vadd.f32 %v1259_v49, %v1036_v11 }
 0x195   : > { %v1464_v1 = vmul.f32 %v3282_v56, %v3973_v37  ;;  %3303 = vtanh.f32 %v1336_v8  ;;  %v3056_v20 = vpop.f32.mrf.mxu1  ;;  %v1302_v28 = vadd.f32 %v3016_v16, %v1223_v48  ;;  %v1227_v25 = vrot.slane %v1161_v58, %v3952_v9 }
 0x196   : > { %1563 = vadd.xlane.f32.xlu0 %v1463_v40  ;;  %v3284_v62 = vpop.eup %3283  ;;  %3305 = vtanh.f32 %v1299_v13  ;;  %v889_v26 = vpop.f32.mrf.mxu0  ;;  %v1342_v43 = vadd.f32 %v3056_v20, %v1263_v38 }
 0x197   : > { %v3286_v2 = vpop.eup %3285  ;;  %v1427_v60 = vmul.f32 %v3284_v62, %v3973_v37  ;;  %3307 = vtanh.f32 %v1339_v5  ;;  %v1049_v31 = vpop.f32.mrf.mxu1  ;;  %v1300_v39 = vadd.f32 %v1223_v48, %v889_v26 }
 0x198   : > { %1557 = vadd.xlane.f32.xlu1 %v1460_v44  ;;  %v3288_v10 = vpop.eup %3287  ;;  %v1469_v14 = vmul.f32 %v3286_v2, %v3973_v37  ;;  %3309 = vtanh.f32 %v1297_v21  ;;  %v3017_v36 = vpop.f32.mrf.mxu0  ;;  %v1340_v47 = vadd.f32 %v1263_v38, %v1049_v31 }
 0x199   : > { %v1467_v18 = vmul.f32 %v3288_v10, %v3973_v37  ;;  %3311 = vtanh.f32 %v1302_v28  ;;  %v3057_v42 = vpop.f32.mrf.mxu1 }
 0x19a   : > { %1569 = vadd.xlane.f32.xlu0 %v1466_v32  ;;  %3313 = vtanh.f32 %v1337_v33  ;;  %v892_v46 = vpop.f32.mrf.mxu0 }
 0x19b   : > { %v3290_v15 = vpop.eup %3289  ;;  %3315 = vtanh.f32 %v1300_v39  ;;  %v1052_v50 = vpop.f32.mrf.mxu1  ;;  %v1301_v53 = vadd.f32 %v1223_v48, %v892_v46 }
 0x19c   : > { %1567 = vadd.xlane.f32.xlu1 %v1465_v54  ;;  %v3292_v19 = vpop.eup %3291  ;;  %v1468_v22 = vmul.f32 %v3290_v15, %v3973_v37  ;;  %3317 = vtanh.f32 %v1342_v43  ;;  %v3020_v57 = vpop.f32.mrf.mxu0  ;;  %v1341_v2 = vadd.f32 %v1263_v38, %v1052_v50 }
 0x19d   : > { %v3294_v24 = vpop.eup %3293  ;;  %v1430_v29 = vmul.f32 %v3292_v19, %v3973_v37  ;;  %3319 = vtanh.f32 %v1340_v47  ;;  %v3060_v0 = vpop.f32.mrf.mxu1  ;;  %v1306_v13 = vadd.f32 %v3020_v57, %v1227_v25 }
 0x19e   : > { %1495 = vadd.xlane.f32.xlu0 %v1429_v59  ;;  %v3296_v30 = vpop.eup %3295  ;;  %v1433_v34 = vmul.f32 %v3294_v24, %v3973_v37  ;;  %v1303_v59 = vadd.f32 %v3017_v36, %v1223_v48  ;;  %3321 = vtanh.f32 %v1301_v53  ;;  %v905_v8 = vpop.f32.mrf.mxu0 }
 0x19f   : > { %v3298_v35 = vpop.eup %3297  ;;  %v1470_v40 = vmul.f32 %v3296_v30, %v3973_v37  ;;  %v1065_v12 = vpop.f32.mrf.mxu1 }
 0x1a0   : > { %1565 = vadd.xlane.f32.xlu1 %v1464_v1  ;;  %v3300_v41 = vpop.eup %3299  ;;  %v1473_v44 = vmul.f32 %v3298_v35, %v3973_v37  ;;  %v4041_v1 = vrot.slane %v1179_v51, %v3938_v61  ;;  %3323 = vtanh.f32 %v1303_v59  ;;  %v3021_v16 = vpop.f32.mrf.mxu0 }
 0x1a1   : > { %v3302_v45 = vpop.eup %3301  ;;  %v1428_v49 = vmul.f32 %v3300_v41, %v3973_v37  ;;  %3325 = vtanh.f32 %v1341_v2  ;;  %v3061_v48 = vpop.f32.mrf.mxu1  ;;  %v1307_v24 = vadd.f32 %v3021_v16, %v1227_v25 }
 0x1a2   : > { %1491 = vadd.xlane.f32.xlu0 %v1427_v60  ;;  %v3304_v32 = vpop.eup %3303  ;;  %v1431_v54 = vmul.f32 %v3302_v45, %v3973_v37  ;;  %v1343_v60 = vadd.f32 %v3057_v42, %v1263_v38  ;;  %v1267_v61 = vrot.slane %v4041_v1, %v3952_v9  ;;  %v1231_v42 = vrot.slane %v3942_v4, %v3952_v9 }
 0x1a3   : > { %v3306_v56 = vpop.eup %3305  ;;  %v1471_v62 = vmul.f32 %v3304_v32, %v3973_v37  ;;  %v1068_v33 = vpop.f32.mrf.mxu1  ;;  %v1209_v45 = vcombine.high %v4027_v27, %v4027_v27 }
 0x1a4   : > { %1575 = vadd.xlane.f32.xlu1 %v1469_v14  ;;  %v3308_v63 = vpop.eup %3307  ;;  %v1434_v3 = vmul.f32 %v3306_v56, %v3973_v37  ;;  %3327 = vtanh.f32 %v1343_v60  ;;  %v1344_v17 = vadd.f32 %v1267_v61, %v1065_v12  ;;  %v1346_v19 = vadd.f32 %v3060_v0, %v1267_v61 }
 0x1a5   : > { %v3310_v6 = vpop.eup %3309  ;;  %v1474_v10 = vmul.f32 %v3308_v63, %v3973_v37  ;;  %3329 = vtanh.f32 %v1306_v13  ;;  %v1347_v35 = vadd.f32 %v3061_v48, %v1267_v61  ;;  %v1345_v39 = vadd.f32 %v1267_v61, %v1068_v33  ;;  %v3064_v43 = vpop.f32.mrf.mxu1 }
 0x1a6   : > { %1571 = vadd.xlane.f32.xlu0 %v1467_v18  ;;  %v3312_v11 = vpop.eup %3311  ;;  %v1432_v14 = vmul.f32 %v3310_v6, %v3973_v37  ;;  %3331 = vtanh.f32 %v1344_v17  ;;  %v1271_v4 = vrot.slane %v1209_v45, %v3952_v9  ;;  %v1235_v17 = vrot.slane %v3947_v7, %v3952_v9 }
 0x1a7   : > { %v3314_v15 = vpop.eup %3313  ;;  %v1437_v5 = vmul.f32 %v3312_v11, %v3973_v37  ;;  %3333 = vtanh.f32 %v1346_v19  ;;  %v1081_v53 = vpop.f32.mrf.mxu1 }
 0x1a8   : > { %1573 = vadd.xlane.f32.xlu1 %v1468_v22  ;;  %v3316_v18 = vpop.eup %3315  ;;  %v1472_v20 = vmul.f32 %v3314_v15, %v3973_v37  ;;  %v908_v22 = vpop.f32.mrf.mxu0  ;;  %3335 = vtanh.f32 %v1307_v24  ;;  %v1350_v58 = vadd.f32 %v3064_v43, %v1271_v4  ;;  %v1348_v2 = vadd.f32 %v1271_v4, %v1081_v53 }
 0x1a9   : > { %v3318_v21 = vpop.eup %3317  ;;  %v1435_v26 = vmul.f32 %v3316_v18, %v3973_v37  ;;  %v1305_v46 = vadd.f32 %v1227_v25, %v908_v22  ;;  %v3065_v63 = vpop.f32.mrf.mxu1 }
 0x1aa   : > { %1497 = vadd.xlane.f32.xlu0 %v1430_v29  ;;  %v3320_v28 = vpop.eup %3319  ;;  %v1304_v29 = vadd.f32 %v1227_v25, %v905_v8  ;;  %v1477_v30 = vmul.f32 %v3318_v21, %v3973_v37  ;;  %v1351_v19 = vadd.f32 %v3065_v63, %v1271_v4 }
 0x1ab   : > { %v3322_v31 = vpop.eup %3321  ;;  %v1475_v36 = vmul.f32 %v3320_v28, %v3973_v37 }
 0x1ac   : > { %1503 = vadd.xlane.f32.xlu1 %v1433_v34  ;;  %v3024_v34 = vpop.f32.mrf.mxu0  ;;  %3337 = vtanh.f32 %v1304_v29 }
 0x1ad   : > { %v3324_v38 = vpop.eup %3323  ;;  %3339 = vtanh.f32 %v1347_v35  ;;  %v1310_v32 = vadd.f32 %v3024_v34, %v1231_v42 }
 0x1ae   : > { %1577 = vadd.xlane.f32.xlu0 %v1470_v40  ;;  %v1436_v40 = vmul.f32 %v3322_v31, %v3973_v37  ;;  %v3326_v41 = vpop.eup %3325  ;;  %v1438_v47 = vmul.f32 %v3324_v38, %v3973_v37  ;;  %3341 = vtanh.f32 %v1345_v39 }
 0x1af   : > { %v1476_v50 = vmul.f32 %v3326_v41, %v3973_v37  ;;  %3343 = vtanh.f32 %v1305_v46 }
 0x1b0   : > { %1583 = vadd.xlane.f32.xlu1 %v1473_v44  ;;  %v921_v44 = vpop.f32.mrf.mxu0  ;;  %3345 = vtanh.f32 %v1310_v32 }
 0x1b1   : > { %v1308_v56 = vadd.f32 %v1231_v42, %v921_v44 }
 0x1b2   : > { %1493 = vadd.xlane.f32.xlu0 %v1428_v49  ;;  %v3328_v49 = vpop.eup %3327 }
 0x1b3   : > { %v3330_v51 = vpop.eup %3329  ;;  %v1478_v27 = vmul.f32 %v3328_v49, %v3973_v37  ;;  %3347 = vtanh.f32 %v1308_v56 }
 0x1b4   : > { %1499 = vadd.xlane.f32.xlu1 %v1431_v54  ;;  %v3025_v54 = vpop.f32.mrf.mxu0  ;;  %v3332_v57 = vpop.eup %3331  ;;  %v1441_v59 = vmul.f32 %v3330_v51, %v3973_v37  ;;  %3349 = vtanh.f32 %v1350_v58 }
 0x1b5   : > { %3351 = vtanh.f32 %v1348_v2  ;;  %v1311_v12 = vadd.f32 %v3025_v54, %v1231_v42 }
 0x1b6   : > { %1579 = vadd.xlane.f32.xlu0 %v1471_v62  ;;  %v3334_v62 = vpop.eup %3333  ;;  %v924_v0 = vpop.f32.mrf.mxu0 }
 0x1b7   : > { %v3336_v6 = vpop.eup %3335  ;;  %v1309_v8 = vadd.f32 %v1231_v42, %v924_v0  ;;  %v1481_v60 = vmul.f32 %v3334_v62, %v3973_v37 }
 0x1b8   : > { %1505 = vadd.xlane.f32.xlu1 %v1434_v3  ;;  %v1479_v3 = vmul.f32 %v3332_v57, %v3973_v37  ;;  %v3028_v11 = vpop.f32.mrf.mxu0  ;;  %v1442_v13 = vmul.f32 %v3336_v6, %v3973_v37 }
 0x1b9   : > { %v3338_v25 = vpop.eup %3337  ;;  %3353 = vtanh.f32 %v1309_v8  ;;  %v1314_v22 = vadd.f32 %v3028_v11, %v1235_v17 }
 0x1ba   : > { %1585 = vadd.xlane.f32.xlu0 %v1474_v10  ;;  %v1084_v10 = vpop.f32.mrf.mxu1  ;;  %v3340_v61 = vpop.eup %3339  ;;  %v1439_v15 = vmul.f32 %v3338_v25, %v3973_v37  ;;  %3355 = vtanh.f32 %v1311_v12 }
 0x1bb   : > { %v3342_v16 = vpop.eup %3341  ;;  %v937_v18 = vpop.f32.mrf.mxu0  ;;  %v1482_v21 = vmul.f32 %v3340_v61, %v3973_v37 }
 0x1bc   : > { %1501 = vadd.xlane.f32.xlu1 %v1432_v14  ;;  %v1349_v14 = vadd.f32 %v1271_v4, %v1084_v10  ;;  %v3344_v48 = vpop.eup %3343  ;;  %v1480_v24 = vmul.f32 %v3342_v16, %v3973_v37 }
 0x1bd   : > { %v3029_v29 = vpop.f32.mrf.mxu0  ;;  %v1440_v31 = vmul.f32 %v3344_v48, %v3973_v37 }
 0x1be   : > { %1511 = vadd.xlane.f32.xlu0 %v1437_v5  ;;  %v3068_v5 = vpop.f32.mrf.mxu1  ;;  %3357 = vtanh.f32 %v1349_v14  ;;  %v1315_v46 = vadd.f32 %v3029_v29, %v1235_v17 }
 0x1bf   : > { %3359 = vtanh.f32 %v1351_v19  ;;  %v940_v38 = vpop.f32.mrf.mxu0 }
 0x1c0   : > { %1581 = vadd.xlane.f32.xlu1 %v1472_v20  ;;  %v1211_v20 = vcombine.high %v4041_v1, %v4041_v1  ;;  %v1097_v28 = vpop.f32.mrf.mxu1  ;;  %3361 = vtanh.f32 %v1314_v22  ;;  %v1313_v42 = vadd.f32 %v1235_v17, %v940_v38 }
 0x1c2   : > { %1507 = vadd.xlane.f32.xlu0 %v1435_v26  ;;  %v3346_v26 = vpop.eup %3345  ;;  %v1275_v7 = vrot.slane %v1211_v20, %v3952_v9 }
 0x1c3   : > { %v3348_v1 = vpop.eup %3347  ;;  %v1445_v34 = vmul.f32 %v3346_v26, %v3973_v37 }
 0x1c4   : > { %1591 = vadd.xlane.f32.xlu1 %v1477_v30  ;;  %v1312_v30 = vadd.f32 %v1235_v17, %v937_v18  ;;  %v1354_v33 = vadd.f32 %v3068_v5, %v1275_v7  ;;  %v3350_v35 = vpop.eup %3349  ;;  %v1352_v39 = vadd.f32 %v1275_v7, %v1097_v28 }
 0x1c5   : > { %v3352_v41 = vpop.eup %3351  ;;  %v1485_v43 = vmul.f32 %v3350_v35, %v3973_v37 }
 0x1c6   : > { %1587 = vadd.xlane.f32.xlu0 %v1475_v36  ;;  %v3069_v36 = vpop.f32.mrf.mxu1  ;;  %3363 = vtanh.f32 %v1312_v30  ;;  %v3354_v44 = vpop.eup %3353 }
 0x1c7   : > { %3365 = vtanh.f32 %v1354_v33  ;;  %v3356_v49 = vpop.eup %3355  ;;  %v1355_v4 = vadd.f32 %v3069_v36, %v1275_v7 }
 0x1c8   : > { %1509 = vadd.xlane.f32.xlu1 %v1436_v40  ;;  %v1443_v40 = vmul.f32 %v3348_v1, %v3973_v37  ;;  %v1100_v45 = vpop.f32.mrf.mxu1  ;;  %3367 = vtanh.f32 %v1352_v39  ;;  %v1446_v53 = vmul.f32 %v3356_v49, %v3973_v37 }
 0x1c9   : > { %3369 = vtanh.f32 %v1313_v42  ;;  %v1353_v32 = vadd.f32 %v1275_v7, %v1100_v45 }
 0x1ca   : > { %1513 = vadd.xlane.f32.xlu0 %v1438_v47  ;;  %v1483_v47 = vmul.f32 %v3352_v41, %v3973_v37  ;;  %3371 = vtanh.f32 %v1315_v46 }
 0x1cb   : > { %v3358_v51 = vpop.eup %3357  ;;  %3373 = vtanh.f32 %v1353_v32 }
 0x1cc   : > { %1589 = vadd.xlane.f32.xlu1 %v1476_v50  ;;  %v1444_v50 = vmul.f32 %v3354_v44, %v3973_v37  ;;  %v3360_v54 = vpop.eup %3359  ;;  %v1484_v56 = vmul.f32 %v3358_v51, %v3973_v37  ;;  %3375 = vtanh.f32 %v3963_v23 }
 0x1cd   : > { %v1486_v57 = vmul.f32 %v3360_v54, %v3973_v37  ;;  %3377 = vtanh.f32 %v1355_v4 }
 0x1ce   : > { %1593 = vadd.xlane.f32.xlu0 %v1478_v27  ;;  %v3362_v27 = vpop.eup %3361 }
 0x1d0   : > { %1519 = vadd.xlane.f32.xlu1 %v1441_v59  ;;  %v1449_v59 = vmul.f32 %v3362_v27, %v3973_v37  ;;  %v4173_v27 = vand.u32 127, %v1118_v52 }
 0x1d2   : > { %1595 = vadd.xlane.f32.xlu0 %v1479_v3  ;;  %v1704_v52 = vadd.s32 4294967272, %v4173_v27  ;;  %vm1621_vm10 = vcmp.lt.s32.totalorder %v4173_v27, 24 }
 0x1d3   : > { %v3364_v58 = vpop.eup %3363 }
 0x1d4   : > { %1599 = vadd.xlane.f32.xlu1 %v1481_v60  ;;  %v3366_v62 = vpop.eup %3365  ;;  %v1447_v63 = vmul.f32 %v3364_v58, %v3973_v37 }
 0x1d5   : > { %v3368_v0 = vpop.eup %3367  ;;  %v1489_v2 = vmul.f32 %v3366_v62, %v3973_v37  ;;  %v1697_v62 = vadd.s32 4294967280, %v4173_v27 }
 0x1d6   : > { %1521 = vadd.xlane.f32.xlu0 %v1442_v13  ;;  %v3370_v3 = vpop.eup %3369  ;;  %v1487_v23 = vmul.f32 %v3368_v0, %v3973_v37 }
 0x1d7   : > { %v3372_v6 = vpop.eup %3371  ;;  %v1448_v8 = vmul.f32 %v3370_v3, %v3973_v37 }
 0x1d8   : > { %1515 = vadd.xlane.f32.xlu1 %v1439_v15  ;;  %v3374_v60 = vpop.eup %3373  ;;  %v1450_v25 = vmul.f32 %v3372_v6, %v3973_v37 }
 0x1d9   : > { %v3376_v10 = vpop.eup %3375  ;;  %v1488_v11 = vmul.f32 %v3374_v60, %v3973_v37 }
 0x1da   : > { %1601 = vadd.xlane.f32.xlu0 %v1482_v21  ;;  %v3378_v12 = vpop.eup %3377  ;;  %v1458_v13 = vmul.f32 %v3376_v10, %v3973_v37 }
 0x1db   : > { %v1490_v61 = vmul.f32 %v3378_v12, %v3973_v37  ;;  %v4207_v12 = vsub.s32 %v1704_v52, %v3935_v55 }
 0x1dc   : > { %1597 = vadd.xlane.f32.xlu1 %v1480_v24 }
 0x1de   : > { %1517 = vadd.xlane.f32.xlu0 %v1440_v31 }
 0x1e0   : > { %1527 = vadd.xlane.f32.xlu1 %v1445_v34 }
 0x1e2   : > { %1523 = vadd.xlane.f32.xlu0 %v1443_v40 }
 0x1e4   : > { %1607 = vadd.xlane.f32.xlu1 %v1485_v43 }
 0x1e6   : > { %1603 = vadd.xlane.f32.xlu0 %v1483_v47 }
 0x1e8   : > { %1525 = vadd.xlane.f32.xlu1 %v1444_v50 }
 0x1ea   : > { %1529 = vadd.xlane.f32.xlu0 %v1446_v53 }
 0x1ec   : > { %1605 = vadd.xlane.f32.xlu1 %v1484_v56 }
 0x1ee   : > { %1609 = vadd.xlane.f32.xlu0 %v1486_v57 }
 0x1f0   : > { %1535 = vadd.xlane.f32.xlu1 %v1449_v59  ;;  %v1690_v59 = vadd.s32 4294967288, %v4173_v27 }
 0x1f2   : > { %1531 = vadd.xlane.f32.xlu0 %v1447_v63  ;;  %v4190_v3 = vsub.s32 %v1690_v59, %v3935_v55 }
 0x1f4   : > { %1615 = vadd.xlane.f32.xlu1 %v1489_v2  ;;  %v4187_v2 = vsub.s32 %v4173_v27, %v3935_v55 }
 0x1f6   : > { %1611 = vadd.xlane.f32.xlu0 %v1487_v23  ;;  %v4194_v23 = vsub.s32 %v1697_v62, %v3935_v55 }
 0x1f8   : > { %1533 = vadd.xlane.f32.xlu1 %v1448_v8 }
 0x1fa   : > { %1537 = vadd.xlane.f32.xlu0 %v1450_v25 }
 0x1fc   : > { %1613 = vadd.xlane.f32.xlu1 %v1488_v11 }
 0x1fe   : > { %1553 = vadd.xlane.f32.xlu0 %v1458_v13 }
 0x200   : > { %1617 = vadd.xlane.f32.xlu1 %v1490_v61 }
 0x20b   : > { %v4094_v14 = vpop.xlane.xlu0 %1539 }
 0x20c   : > { %v1809_v25 = vrot.slane %v4094_v14, %v4187_v2 }
 0x20d   : > { %v4096_v15 = vpop.xlane.xlu1 %1541 }
 0x20e   : > { %v1813_v10 = vrot.slane %v4096_v15, %v4190_v3 }
 0x20f   : > { %v4098_v16 = vpop.xlane.xlu0 %1545 }
 0x211   : > { %v4100_v17 = vpop.xlane.xlu1 %1543 }
 0x212   : > { %v1818_v13 = vrot.slane %v4100_v17, %v4194_v23  ;;  %v1823_v17 = vrot.slane %v4098_v16, %v4207_v12 }
 0x213   : > { %v4102_v5 = vpop.xlane.xlu0 %1547 }
 0x215   : > { %v4104_v18 = vpop.xlane.xlu1 %1551 }
 0x217   : > { %v4106_v19 = vpop.xlane.xlu0 %1559 }
 0x218   : > { %v1856_v9 = vrot.slane %v4106_v19, %v4194_v23 }
 0x219   : > { %v4108_v20 = vpop.xlane.xlu1 %1549 }
 0x21b   : > { %v4110_v21 = vpop.xlane.xlu0 %1555 }
 0x21c   : > { %v1847_v14 = vrot.slane %v4110_v21, %v4187_v2 }
 0x21d   : > { %v4112_v37 = vpop.xlane.xlu1 %1561 }
 0x21f   : > { %v1564_v48 = vpop.xlane.xlu0 %1563 }
 0x220   : > { %v1866_v61 = vrot.slane %v1564_v48, %v4187_v2 }
 0x221   : > { %v1558_v22 = vpop.xlane.xlu1 %1557 }
 0x222   : > { %v1851_v11 = vrot.slane %v1558_v22, %v4190_v3  ;;  %v1814_v22 = vsel %vm1695_vm1, %v1813_v10, %v1809_v25 }
 0x223   : > { %v4114_v24 = vpop.xlane.xlu0 %1569  ;;  %v1819_v48 = vsel %vm1702_vm2, %v1818_v13, %v1814_v22 }
 0x224   : > { %v1852_v62 = vsel %vm1695_vm1, %v1851_v11, %v1847_v14  ;;  %v1880_v11 = vrot.slane %v4114_v24, %v4207_v12 }
 0x225   : > { %v4116_v26 = vpop.xlane.xlu1 %1567  ;;  %v1857_v16 = vsel %vm1702_vm2, %v1856_v9, %v1852_v62 }
 0x226   : > { %v1875_v52 = vrot.slane %v4116_v26, %v4194_v23 }
 0x227   : > { %v4118_v28 = vpop.xlane.xlu0 %1495 }
 0x229   : > { %v1566_v29 = vpop.xlane.xlu1 %1565 }
 0x22a   : > { %v1870_v8 = vrot.slane %v1566_v29, %v4190_v3 }
 0x22b   : > { %v4120_v7 = vpop.xlane.xlu0 %1491 }
 0x22c   : > { %v1871_v59 = vsel %vm1695_vm1, %v1870_v8, %v1866_v61  ;;  %v1832_v8 = vrot.slane %v4108_v20, %v4190_v3  ;;  %v1828_v61 = vrot.slane %v4102_v5, %v4187_v2  ;;  %v1689_v24 = vrot.slane %v4120_v7, %v4187_v2 }
 0x22d   : > { %v4122_v30 = vpop.xlane.xlu1 %1575  ;;  %v1876_v25 = vsel %vm1702_vm2, %v1875_v52, %v1871_v59 }
 0x22e   : > { %v1881_v9 = vsel %vm1709_vm3, %v1880_v11, %v1876_v25  ;;  %v4261_v14 = vsel %vm1695_vm1, %v1832_v8, %v1828_v61  ;;  %v1894_v7 = vrot.slane %v4122_v30, %v4194_v23 }
 0x22f   : > { %v4124_v31 = vpop.xlane.xlu0 %1571 }
 0x230   : > { %v1885_v26 = vrot.slane %v4124_v31, %v4187_v2 }
 0x231   : > { %v4126_v1 = vpop.xlane.xlu1 %1573 }
 0x232   : > { %v1889_v10 = vrot.slane %v4126_v1, %v4190_v3  ;;  %v1861_v1 = vrot.slane %v4112_v37, %v4207_v12 }
 0x233   : > { %v4128_v33 = vpop.xlane.xlu0 %1497 }
 0x234   : > { %v1862_v5 = vsel %vm1709_vm3, %v1861_v1, %v1857_v16  ;;  %v1890_v37 = vsel %vm1695_vm1, %v1889_v10, %v1885_v26  ;;  %v1708_v8 = vrot.slane %v4128_v33, %v4207_v12 }
 0x235   : > { %v4130_v34 = vpop.xlane.xlu1 %1503  ;;  %v1895_v25 = vsel %vm1702_vm2, %v1894_v7, %v1890_v37 }
 0x237   : > { %v4132_v35 = vpop.xlane.xlu0 %1577 }
 0x238   : > { %v1899_v59 = vrot.slane %v4132_v35, %v4207_v12  ;;  %v4280_v35 = vsel %vm1996_vm4, %v1881_v9, %v1862_v5 }
 0x239   : > { %v4134_v36 = vpop.xlane.xlu1 %1583 }
 0x23b   : > { %v4136_v38 = vpop.xlane.xlu0 %1493 }
 0x23c   : > { %v1694_v19 = vrot.slane %v4136_v38, %v4190_v3 }
 0x23d   : > { %v4138_v39 = vpop.xlane.xlu1 %1499 }
 0x23e   : > { %v1714_v31 = vrot.slane %v4138_v39, %v4187_v2  ;;  %v1696_v39 = vsel %vm1695_vm1, %v1694_v19, %v1689_v24 }
 0x23f   : > { %v4140_v40 = vpop.xlane.xlu0 %1579 }
 0x241   : > { %v4142_v41 = vpop.xlane.xlu1 %1505 }
 0x242   : > { %v1728_v16 = vrot.slane %v4142_v41, %v4207_v12 }
 0x243   : > { %v4144_v42 = vpop.xlane.xlu0 %1585 }
 0x245   : > { %v4146_v43 = vpop.xlane.xlu1 %1501 }
 0x246   : > { %v1718_v13 = vrot.slane %v4146_v43, %v4190_v3  ;;  %v4258_v43 = vsel %vm1709_vm3, %v1823_v17, %v1819_v48  ;;  %v1701_v17 = vrot.slane %v4118_v28, %v4194_v23  ;;  %v1723_v48 = vrot.slane %v4130_v34, %v4194_v23 }
 0x247   : > { %v4148_v44 = vpop.xlane.xlu0 %1511  ;;  %v4294_v34 = vsel %vm1709_vm3, %v1899_v59, %v1895_v25 }
 0x248   : > { %v1719_v22 = vsel %vm1695_vm1, %v1718_v13, %v1714_v31  ;;  %v1703_v26 = vsel %vm1702_vm2, %v1701_v17, %v1696_v39  ;;  %v1913_v13 = vrot.slane %v4134_v36, %v4194_v23  ;;  %v1918_v36 = vrot.slane %v4144_v42, %v4207_v12 }
 0x249   : > { %v4150_v45 = vpop.xlane.xlu1 %1581  ;;  %v1724_v33 = vsel %vm1702_vm2, %v1723_v48, %v1719_v22  ;;  %v1710_v1 = vsel %vm1709_vm3, %v1708_v8, %v1703_v26 }
 0x24a   : > { %v1908_v30 = vrot.slane %v4150_v45, %v4190_v3  ;;  %v1904_v45 = vrot.slane %v4140_v40, %v4187_v2  ;;  %v1742_v40 = vrot.slane %v4148_v44, %v4194_v23  ;;  %v1729_v9 = vsel %vm1709_vm3, %v1728_v16, %v1724_v33 }
 0x24b   : > { %v4152_v46 = vpop.xlane.xlu0 %1507  ;;  %v1997_v7 = vsel %vm1996_vm4, %v1729_v9, %v1710_v1 }
 0x24c   : > { %v1909_v61 = vsel %vm1695_vm1, %v1908_v30, %v1904_v45 }
 0x24d   : > { %v4154_v47 = vpop.xlane.xlu1 %1591  ;;  %v1914_v5 = vsel %vm1702_vm2, %v1913_v13, %v1909_v61 }
 0x24f   : > { %v4156_v49 = vpop.xlane.xlu0 %1587 }
 0x250   : > { %v1923_v44 = vrot.slane %v4156_v49, %v4187_v2  ;;  %v1932_v49 = vrot.slane %v4154_v47, %v4194_v23  ;;  %v1919_v47 = vsel %vm1709_vm3, %v1918_v36, %v1914_v5 }
 0x251   : > { %v4158_v32 = vpop.xlane.xlu1 %1509 }
 0x252   : > { %v1737_v62 = vrot.slane %v4158_v32, %v4190_v3  ;;  %v1733_v32 = vrot.slane %v4152_v46, %v4187_v2 }
 0x253   : > { %v4160_v50 = vpop.xlane.xlu0 %1513 }
 0x254   : > { %v1738_v46 = vsel %vm1695_vm1, %v1737_v62, %v1733_v32 }
 0x255   : > { %v4162_v51 = vpop.xlane.xlu1 %1589  ;;  %v1743_v31 = vsel %vm1702_vm2, %v1742_v40, %v1738_v46 }
 0x256   : > { %v1927_v41 = vrot.slane %v4162_v51, %v4190_v3 }
 0x257   : > { %v4164_v53 = vpop.xlane.xlu0 %1593 }
 0x258   : > { %v1937_v30 = vrot.slane %v4164_v53, %v4207_v12 }
 0x259   : > { %v4166_v54 = vpop.xlane.xlu1 %1519 }
 0x25a   : > { %v1761_v51 = vrot.slane %v4166_v54, %v4194_v23  ;;  %v1928_v54 = vsel %vm1695_vm1, %v1927_v41, %v1923_v44 }
 0x25b   : > { %v4168_v4 = vpop.xlane.xlu0 %1595 }
 0x25c   : > { %v1942_v22 = vrot.slane %v4168_v4, %v4187_v2  ;;  %v1933_v4 = vsel %vm1702_vm2, %v1932_v49, %v1928_v54 }
 0x25d   : > { %v4170_v56 = vpop.xlane.xlu1 %1599 }
 0x25e   : > { %v1951_v53 = vrot.slane %v4170_v56, %v4194_v23 }
 0x25f   : > { %v4175_v57 = vpop.xlane.xlu0 %1521 }
 0x261   : > { %v4177_v58 = vpop.xlane.xlu1 %1515 }
 0x262   : > { %v1752_v11 = vrot.slane %v4177_v58, %v4187_v2 }
 0x263   : > { %v4181_v63 = vpop.xlane.xlu0 %1601 }
 0x264   : > { %v1956_v45 = vrot.slane %v4181_v63, %v4207_v12 }
 0x265   : > { %v4183_v0 = vpop.xlane.xlu1 %1597 }
 0x267   : > { %v4196_v6 = vpop.xlane.xlu0 %1517 }
 0x268   : > { %v1756_v28 = vrot.slane %v4196_v6, %v4190_v3  ;;  %v1747_v6 = vrot.slane %v4160_v50, %v4207_v12 }
 0x269   : > { %v4199_v60 = vpop.xlane.xlu1 %1527 }
 0x26a   : > { %v1757_v50 = vsel %vm1695_vm1, %v1756_v28, %v1752_v11  ;;  %v1748_v37 = vsel %vm1709_vm3, %v1747_v6, %v1743_v31  ;;  %v1780_v8 = vrot.slane %v4199_v60, %v4194_v23 }
 0x26b   : > { %v4212_v29 = vpop.xlane.xlu0 %1523  ;;  %v1762_v39 = vsel %vm1702_vm2, %v1761_v51, %v1757_v50  ;;  %v1999_v48 = vsel %vm1998_vm5, %v1748_v37, %v1997_v7 }
 0x26c   : > { %v1771_v59 = vrot.slane %v4212_v29, %v4187_v2 }
 0x26d   : > { %v4217_v15 = vpop.xlane.xlu1 %1607 }
 0x26e   : > { %v1970_v61 = vrot.slane %v4217_v15, %v4194_v23  ;;  %v2011_v15 = vsel %vm1998_vm5, %v4294_v34, %v4280_v35 }
 0x26f   : > { %v4228_v21 = vpop.xlane.xlu0 %1603  ;;  %v2012_v51 = vsel %vm2000_vm6, %v1919_v47, %v2011_v15 }
 0x271   : > { %v4244_v20 = vpop.xlane.xlu1 %1525 }
 0x272   : > { %v1775_v58 = vrot.slane %v4244_v20, %v4190_v3  ;;  %v1946_v20 = vrot.slane %v4183_v0, %v4190_v3  ;;  %v1766_v0 = vrot.slane %v4175_v57, %v4207_v12 }
 0x273   : > { %v4255_v38 = vpop.xlane.xlu0 %1529 }
 0x274   : > { %v1776_v29 = vsel %vm1695_vm1, %v1775_v58, %v1771_v59  ;;  %v1785_v62 = vrot.slane %v4255_v38, %v4207_v12  ;;  %v1947_v57 = vsel %vm1695_vm1, %v1946_v20, %v1942_v22  ;;  %v1767_v25 = vsel %vm1709_vm3, %v1766_v0, %v1762_v39 }
 0x275   : > { %v4273_v52 = vpop.xlane.xlu1 %1605  ;;  %v1781_v28 = vsel %vm1702_vm2, %v1780_v8, %v1776_v29  ;;  %v1952_v56 = vsel %vm1702_vm2, %v1951_v53, %v1947_v57  ;;  %v2001_v6 = vsel %vm2000_vm6, %v1767_v25, %v1999_v48  ;;  %v1837_v58 = vrot.slane %v4104_v18, %v4194_v23 }
 0x276   : > { %v1965_v38 = vrot.slane %v4273_v52, %v4190_v3  ;;  %v1961_v52 = vrot.slane %v4228_v21, %v4187_v2  ;;  %v1786_v33 = vsel %vm1709_vm3, %v1785_v62, %v1781_v28  ;;  %v1957_v44 = vsel %vm1709_vm3, %v1956_v45, %v1952_v56 }
 0x277   : > { %v4291_v10 = vpop.xlane.xlu0 %1609  ;;  %v2003_v41 = vsel %vm2002_vm7, %v1786_v33, %v2001_v6  ;;  %v1838_v5 = vsel %vm1702_vm2, %v1837_v58, %v4261_v14  ;;  %v2122_v53 = vsub.s32 4, %v3935_v55  ;;  %v2141_v28 = vsub.s32 5, %v3935_v55  ;;  %v4721_v6 = vld [vmem:[#allocation21_spill] sm:$0xff] }
 0x278   : > { %v1966_v63 = vsel %vm1695_vm1, %v1965_v38, %v1961_v52  ;;  %v1975_v21 = vrot.slane %v4291_v10, %v4207_v12  ;;  %v1938_v10 = vsel %vm1709_vm3, %v1937_v30, %v1933_v4  ;;  %v2179_v33 = vsub.s32 7, %v3935_v55 }
 0x279   : > { %v1536_v19 = vpop.xlane.xlu1 %1535  ;;  %v2013_v37 = vsel %vm2002_vm7, %v1938_v10, %v2012_v51 }
 0x27a   : > { %v1799_v16 = vrot.slane %v1536_v19, %v4194_v23  ;;  %v2014_v39 = vsel %vm2004_vm8, %v1957_v44, %v2013_v37 }
 0x27b   : > { %v1532_v24 = vpop.xlane.xlu0 %1531 }
 0x27c   : > { %v1790_v60 = vrot.slane %v1532_v24, %v4187_v2 }
 0x27d   : > { %v4332_v42 = vpop.xlane.xlu1 %1615 }
 0x27e   : > { %v1989_v35 = vrot.slane %v4332_v42, %v4194_v23 }
 0x27f   : > { %v1612_v17 = vpop.xlane.xlu0 %1611 }
 0x280   : > { %v1980_v1 = vrot.slane %v1612_v17, %v4187_v2  ;;  %v1971_v2 = vsel %vm1702_vm2, %v1970_v61, %v1966_v63 }
 0x281   : > { %v1534_v32 = vpop.xlane.xlu1 %1533  ;;  %v1976_v18 = vsel %vm1709_vm3, %v1975_v21, %v1971_v2  ;;  %v2084_v21 = vsub.s32 2, %v3935_v55 }
 0x282   : > { %v1794_v26 = vrot.slane %v1534_v32, %v4190_v3  ;;  %v2015_v42 = vsel %vm2006_vm11, %v1976_v18, %v2014_v39 }
 0x283   : > { %v1538_v46 = vpop.xlane.xlu0 %1537 }
 0x284   : > { %v1795_v11 = vsel %vm1695_vm1, %v1794_v26, %v1790_v60  ;;  %v1804_v13 = vrot.slane %v1538_v46, %v4207_v12  ;;  %v2160_v60 = vsub.s32 6, %v3935_v55 }
 0x285   : > { %v1800_v40 = vsel %vm1702_vm2, %v1799_v16, %v1795_v11  ;;  %v1614_v19 = vpop.xlane.xlu1 %1613 }
 0x286   : > { %v1805_v9 = vsel %vm1709_vm3, %v1804_v13, %v1800_v40  ;;  %v1984_v50 = vrot.slane %v1614_v19, %v4190_v3  ;;  %v2065_v13 = vsub.s32 1, %v3935_v55  ;;  %v2103_v19 = vsub.s32 3, %v3935_v55 }
 0x287   : > { %v1554_v24 = vpop.xlane.xlu0 %1553  ;;  %v2005_v36 = vsel %vm2004_vm8, %v1805_v9, %v2003_v41 }
 0x288   : > { %v1985_v31 = vsel %vm1695_vm1, %v1984_v50, %v1980_v1  ;;  %v1842_v3 = vrot.slane %v1554_v24, %v4207_v12  ;;  %v2007_v49 = vsel %vm2006_vm11, %v4258_v43, %v2005_v36  ;;  %v3387_v36 = vld [vmem:[%s3876_s20 + $0x80] sm:$0xff]  }
 0x289   : > { %v1618_v34 = vpop.xlane.xlu1 %1617  ;;  %v1990_v54 = vsel %vm1702_vm2, %v1989_v35, %v1985_v31  ;;  %v2381_v44 = vunpack.c.h.bf16 %v3387_v36  ;;  %v2380_v2 = vunpack.c.l.bf16 %v3387_v36  ;;  %v3388_v35 = vld [vmem:[%s3876_s20 + $0x90] sm:$0xff]  }
 0x28a   : > { %v1994_v20 = vrot.slane %v1618_v34, %v4207_v12  ;;  %v1843_v59 = vsel %vm1709_vm3, %v1842_v3, %v1838_v5  ;;  %v2385_v34 = vunpack.c.h.bf16 %v3388_v35  ;;  %v2384_v5 = vunpack.c.l.bf16 %v3388_v35 }
 0x28b   : > { %v2009_v7 = vsel %vm2008_vm9, %v1843_v59, %v2007_v49 }
 0x28c   : > { %v2019_v23 = vsel %vm1621_vm10, %v2009_v7, -1e+30  ;;  %v1995_v14 = vsel %vm1709_vm3, %v1994_v20, %v1990_v54  ;;  %v3389_v54 = vld [vmem:[%s3876_s20 + $0xa0] sm:$0xff]  }
 0x28d   : > { %v2022_v12 = vsel %vm2021_vm12, %v2019_v23, -inf  ;;  %v2016_v22 = vsel %vm2008_vm9, %v1995_v14, %v2015_v42  ;;  %v2389_v39 = vunpack.c.h.bf16 %v3389_v54 }
 0x28e   : > { %2023 = vmax.xlane.f32.xlu0 %v2022_v12  ;;  %v2020_v43 = vsel %vm1621_vm10, %v2016_v22, -1e+30 }
 0x28f   : > { %v2025_v0 = vsel %vm2021_vm12, %v2020_v43, -inf }
 0x290   : > { %2026 = vmax.xlane.f32.xlu1 %v2025_v0  ;;  %v4480_v0 = vld [vmem:[%s3876_s20 + $0x98] sm:$0xff]  }
 0x317   : > { %v2024_v29 = vpop.xlane.xlu0 %2023 }
 0x318   : > { %v2028_v62 = vsub.f32 %v2019_v23, %v2024_v29  ;;  %v2388_v23 = vunpack.c.l.bf16 %v3389_v54  ;;  %v2386_v29 = vunpack.c.l.bf16 %v4480_v0 }
 0x319   : > { %v2027_v17 = vpop.xlane.xlu1 %2026 }
 0x31a   : > { %v2030_v47 = vmul.f32 1.442695, %v2028_v62  ;;  %v2029_v48 = vsub.f32 %v2020_v43, %v2027_v17  ;;  %v4484_v62 = vld [vmem:[%s3876_s20 + $0x88] sm:$0xff]  }
 0x31b   : > { %v2382_v17 = vunpack.c.l.bf16 %v4484_v62 }
 0x31c   : > { %3379 = vpow2.f32 %v2030_v47  ;;  %v2032_v30 = vmul.f32 1.442695, %v2029_v48 }
 0x31e   : > { %3381 = vpow2.f32 %v2032_v30 }
 0x329   : > { %v3380_v8 = vpop.eup %3379 }
 0x32a   : > { %v2034_v4 = vsel %vm2021_vm12, %v3380_v8, 0.0 }
 0x32b   : > { %v3382_v57 = vpop.eup %3381  ;;  %2035 = vadd.xlane.f32.xlu0 %v2034_v4 }
 0x32c   : > { %v2037_v27 = vsel %vm2021_vm12, %v3382_v57, 0.0 }
 0x32d   : > { %2038 = vadd.xlane.f32.xlu1 %v2037_v27 }
 0x3b4   : > { %v2036_v25 = vpop.xlane.xlu0 %2035 }
 0x3b5   : > { %3383 = vrcp.f32 %v2036_v25 }
 0x3b6   : > { %v2039_v38 = vpop.xlane.xlu1 %2038 }
 0x3b7   : > { %3385 = vrcp.f32 %v2039_v38 }
 0x3c2   : > { %v3384_v32 = vpop.eup %3383 }
 0x3c3   : > { %v4423_v26 = vmul.f32 %v3384_v32, %v3380_v8 }
 0x3c4   : > { %v3386_v45 = vpop.eup %3385 }
 0x3c5   : > { %v2043_v52 = vmul.f32 %v3386_v45, %v3382_v57  ;;  %2654 = vst.msk [vmem:[%s4428_s13] sm:$0xff] %vm2021_vm12, %v4423_v26  ;;  %v4434_v16 = vrot.slane %v4423_v26, %v2122_v53  ;;  %v4437_v46 = vrot.slane %v4423_v26, %v2141_v28  ;;  %v4440_v56 = vrot.slane %v4423_v26, %v2160_v60  ;;  %v3392_v57 = vld [vmem:[%s3876_s20 + $0xb0] sm:$0xff]   ;;  %v4493_v45 = vld [vmem:[%s3876_s20 + $0xa8] sm:$0xff]  }
 0x3c6   : > { %v4447_v61 = vrot.slane %v4423_v26, %v2179_v33  ;;  %v2047_v58 = vrot.slane %v4423_v26, %v4721_v6  ;;  %v2066_v15 = vrot.slane %v4423_v26, %v2065_v13  ;;  %v2085_v10 = vrot.slane %v4423_v26, %v2084_v21 }
 0x3c7   : > { %v2199_v11 = vrot.slane %v2043_v52, %v4721_v6  ;;  %2655 = vst.msk [vmem:[%s4428_s13 + $0x8] sm:$0xff] %vm2021_vm12, %v2043_v52  ;;  %v2218_v63 = vrot.slane %v2043_v52, %v2065_v13  ;;  %v2237_v40 = vrot.slane %v2043_v52, %v2084_v21  ;;  %v2256_v41 = vrot.slane %v2043_v52, %v2103_v19 }
 0x3c8   : > { %v2275_v1 = vrot.slane %v2043_v52, %v2122_v53  ;;  %v2294_v9 = vrot.slane %v2043_v52, %v2141_v28  ;;  %v2313_v50 = vrot.slane %v2043_v52, %v2160_v60  ;;  %v4451_v55 = vrot.slane %v2043_v52, %v2179_v33 }
 0x3c9   : > { %2205 = vbcast.lane.b32.xlu0 %v2199_v11, 264  ;;  %2201 = vbcast.lane.b32.xlu1 %v2199_v11, 256  ;;  %v2104_v24 = vrot.slane %v4423_v26, %v2103_v19  ;;  %v2393_v27 = vunpack.c.h.bf16 %v3392_v57  ;;  %v2392_v25 = vunpack.c.l.bf16 %v3392_v57  ;;  %v2390_v52 = vunpack.c.l.bf16 %v4493_v45 }
 0x3ca   : > { %v2387_v13 = vunpack.c.h.bf16 %v4480_v0 }
 0x3cd   : > { %2224 = vbcast.lane.b32.xlu0 %v2218_v63, 264  ;;  %2220 = vbcast.lane.b32.xlu1 %v2218_v63, 256 }
 0x3d1   : > { %2243 = vbcast.lane.b32.xlu0 %v2237_v40, 264  ;;  %2239 = vbcast.lane.b32.xlu1 %v2237_v40, 256 }
 0x3d5   : > { %2228 = vbcast.lane.b32.xlu0 %v2218_v63, 272  ;;  %2209 = vbcast.lane.b32.xlu1 %v2199_v11, 272 }
 0x3d9   : > { %2262 = vbcast.lane.b32.xlu0 %v2256_v41, 264  ;;  %2258 = vbcast.lane.b32.xlu1 %v2256_v41, 256 }
 0x3dd   : > { %2277 = vbcast.lane.b32.xlu0 %v2275_v1, 256  ;;  %2247 = vbcast.lane.b32.xlu1 %v2237_v40, 272 }
 0x3e1   : > { %2232 = vbcast.lane.b32.xlu0 %v2218_v63, 280  ;;  %2281 = vbcast.lane.b32.xlu1 %v2275_v1, 264 }
 0x3e5   : > { %2296 = vbcast.lane.b32.xlu0 %v2294_v9, 256  ;;  %2213 = vbcast.lane.b32.xlu1 %v2199_v11, 280 }
 0x3e9   : > { %2251 = vbcast.lane.b32.xlu0 %v2237_v40, 280  ;;  %2266 = vbcast.lane.b32.xlu1 %v2256_v41, 272 }
 0x3ed   : > { %2315 = vbcast.lane.b32.xlu0 %v2313_v50, 256  ;;  %2300 = vbcast.lane.b32.xlu1 %v2294_v9, 264 }
 0x3f1   : > { %2304 = vbcast.lane.b32.xlu0 %v2294_v9, 272  ;;  %2285 = vbcast.lane.b32.xlu1 %v2275_v1, 272 }
 0x3f5   : > { %2338 = vbcast.lane.b32.xlu0 %v4451_v55, 264  ;;  %2319 = vbcast.lane.b32.xlu1 %v2313_v50, 264 }
 0x3f9   : > { %2289 = vbcast.lane.b32.xlu0 %v2275_v1, 280  ;;  %2270 = vbcast.lane.b32.xlu1 %v2256_v41, 280 }
 0x3fd   : > { %2308 = vbcast.lane.b32.xlu0 %v2294_v9, 280  ;;  %2334 = vbcast.lane.b32.xlu1 %v4451_v55, 256 }
 0x401   : > { %2049 = vbcast.lane.b32.xlu0 %v2047_v58, 256  ;;  %2323 = vbcast.lane.b32.xlu1 %v2313_v50, 272 }
 0x405   : > { %2068 = vbcast.lane.b32.xlu0 %v2066_v15, 256  ;;  %2342 = vbcast.lane.b32.xlu1 %v4451_v55, 272 }
 0x409   : > { %2076 = vbcast.lane.b32.xlu0 %v2066_v15, 272  ;;  %2327 = vbcast.lane.b32.xlu1 %v2313_v50, 280 }
 0x40d   : > { %2087 = vbcast.lane.b32.xlu0 %v2085_v10, 256  ;;  %2053 = vbcast.lane.b32.xlu1 %v2047_v58, 264 }
 0x411   : > { %2095 = vbcast.lane.b32.xlu0 %v2085_v10, 272  ;;  %2057 = vbcast.lane.b32.xlu1 %v2047_v58, 272 }
 0x415   : > { %2106 = vbcast.lane.b32.xlu0 %v2104_v24, 256  ;;  %2061 = vbcast.lane.b32.xlu1 %v2047_v58, 280 }
 0x419   : > { %2114 = vbcast.lane.b32.xlu0 %v2104_v24, 272  ;;  %2072 = vbcast.lane.b32.xlu1 %v2066_v15, 264 }
 0x41d   : > { %2125 = vbcast.lane.b32.xlu0 %v4434_v16, 256  ;;  %2080 = vbcast.lane.b32.xlu1 %v2066_v15, 280 }
 0x421   : > { %2133 = vbcast.lane.b32.xlu0 %v4434_v16, 272  ;;  %2091 = vbcast.lane.b32.xlu1 %v2085_v10, 264 }
 0x425   : > { %2144 = vbcast.lane.b32.xlu0 %v4437_v46, 256  ;;  %2099 = vbcast.lane.b32.xlu1 %v2085_v10, 280 }
 0x429   : > { %2148 = vbcast.lane.b32.xlu0 %v4437_v46, 264  ;;  %2110 = vbcast.lane.b32.xlu1 %v2104_v24, 264 }
 0x42d   : > { %2163 = vbcast.lane.b32.xlu0 %v4440_v56, 256  ;;  %2118 = vbcast.lane.b32.xlu1 %v2104_v24, 280 }
 0x431   : > { %2152 = vbcast.lane.b32.xlu0 %v4437_v46, 272  ;;  %2129 = vbcast.lane.b32.xlu1 %v4434_v16, 264 }
 0x435   : > { %2186 = vbcast.lane.b32.xlu0 %v4447_v61, 264  ;;  %2137 = vbcast.lane.b32.xlu1 %v4434_v16, 280 }
 0x439   : > { %2156 = vbcast.lane.b32.xlu0 %v4437_v46, 280  ;;  %2167 = vbcast.lane.b32.xlu1 %v4440_v56, 264 }
 0x43b   : > { %v2206_v31 = vpop.permute.xlu0 %2205  ;;  %v2202_v3 = vpop.permute.xlu1 %2201 }
 0x43c   : > { %v2445_v51 = vmul.f32 %v2381_v44, %v2206_v31  ;;  %v2444_v18 = vmul.f32 %v2380_v2, %v2202_v3 }
 0x43d   : > { %2175 = vbcast.lane.b32.xlu0 %v4440_v56, 280  ;;  %2182 = vbcast.lane.b32.xlu1 %v4447_v61, 256 }
 0x43e   : > { %v2548_v37 = vadd.f32 %v2445_v51, %v2444_v18 }
 0x43f   : > { %v2225_v20 = vpop.permute.xlu0 %2224  ;;  %v2221_v59 = vpop.permute.xlu1 %2220 }
 0x440   : > { %v2449_v49 = vmul.f32 %v2385_v34, %v2225_v20  ;;  %v2448_v7 = vmul.f32 %v2384_v5, %v2221_v59 }
 0x441   : > { %2194 = vbcast.lane.b32.xlu0 %v4447_v61, 280  ;;  %2171 = vbcast.lane.b32.xlu1 %v4440_v56, 272  ;;  %v3394_v56 = vld [vmem:[%s3876_s20 + $0xc0] sm:$0xff]  }
 0x442   : > { %v2557_v14 = vadd.f32 %v2449_v49, %v2448_v7  ;;  %v2396_v6 = vunpack.c.l.bf16 %v3394_v56 }
 0x443   : > { %v2244_v42 = vpop.permute.xlu0 %2243  ;;  %v2240_v12 = vpop.permute.xlu1 %2239 }
 0x444   : > { %v2453_v22 = vmul.f32 %v2389_v39, %v2244_v42  ;;  %v2452_v43 = vmul.f32 %v2388_v23, %v2240_v12 }
 0x445   : > { %2190 = vbcast.lane.b32.xlu1 %v4447_v61, 272  ;;  %v2397_v61 = vunpack.c.h.bf16 %v3394_v56 }
 0x446   : > { %v2566_v47 = vadd.f32 %v2453_v22, %v2452_v43 }
 0x447   : > { %v2229_v48 = vpop.permute.xlu0 %2228  ;;  %v2210_v30 = vpop.permute.xlu1 %2209 }
 0x448   : > { %v2450_v8 = vmul.f32 %v2386_v29, %v2229_v48  ;;  %v2446_v4 = vmul.f32 %v2382_v17, %v2210_v30 }
 0x449   : > { %2346 = vbcast.lane.b32.xlu1 %v4451_v55, 280 }
 0x44a   : > { %v2558_v38 = vadd.f32 %v2557_v14, %v2450_v8  ;;  %v4490_v32 = vadd.f32 %v2548_v37, %v2446_v4 }
 0x44b   : > { %v2263_v53 = vpop.permute.xlu0 %2262  ;;  %v2259_v28 = vpop.permute.xlu1 %2258 }
 0x44c   : > { %v2457_v60 = vmul.f32 %v2393_v27, %v2263_v53  ;;  %v2456_v26 = vmul.f32 %v2392_v25, %v2259_v28 }
 0x44e   : > { %v4496_v33 = vadd.f32 %v2457_v60, %v2456_v26 }
 0x44f   : > { %v2278_v16 = vpop.permute.xlu0 %2277  ;;  %v2248_v46 = vpop.permute.xlu1 %2247 }
 0x450   : > { %v2454_v11 = vmul.f32 %v2390_v52, %v2248_v46 }
 0x452   : > { %v2567_v63 = vadd.f32 %v2566_v47, %v2454_v11 }
 0x453   : > { %v2233_v21 = vpop.permute.xlu0 %2232  ;;  %v2282_v40 = vpop.permute.xlu1 %2281 }
 0x454   : > { %3540 = shalt.err (!%p3537_p4)
}
 0x455   : > { %s3541_s29 = scalar_lea.hbm %s4506_s16, 256  ;;  %s3545_s18 = scalar_lea.hbm %s4686_s7, 512 }
 0x456   : > { %p3542_p5 = scmp.ne.s32.totalorder %s4506_s16, %s3541_s29  ;;  %p3546_p2 = scmp.lt.s32.totalorder %s4506_s16, %s4686_s7 }
 0x457   : > { %p3547_p6 = scmp.lt.s32.totalorder %s3545_s18, %s3541_s29 }
 0x458   : > { %p3543_p7 = pnand %p3542_p5, %p4722_p10 }
 0x459   : > { %p3548_p12 = por %p3547_p6, %p3546_p2 }
 0x45a   : > { %p3544_p8 = pneg %p3543_p7 }
 0x45c   : > { %p3549_p0 = pnand %p3548_p12, %p3544_p8 }
 0x45e   : > { %3552 = shalt.err (!%p3549_p0)
}
 0x45f   : > { %s3645_s3 = smov 128   ;;  %s3646_s21 = smov 8   ;;  %v2460_v19 = vmul.f32 %v2396_v6, %v2278_v16  ;;  %v2451_v41 = vmul.f32 %v2387_v13, %v2233_v21  ;;  %v2461_v1 = vmul.f32 %v2397_v61, %v2282_v40  ;;  %v2383_v9 = vunpack.c.h.bf16 %v4484_v62  ;;  %v2297_v58 = vpop.permute.xlu0 %2296  ;;  %v2214_v15 = vpop.permute.xlu1 %2213  ;;  %v4540_v44 = vld [vmem:[%s3876_s20 + $0xb8] sm:$0xff]   ;;  %v3396_v20 = vld [vmem:[%s3876_s20 + $0xd0] sm:$0xff]   ;;  %v3398_v29 = vld [vmem:[%s3876_s20 + $0xc8] sm:$0xff]  }
 0x460   : > { %3099 = dma.vmem_to_hbm [thread:$0]  (%p4722_p10), %s4509_s14, 256, %s4506_s16, %s2662_s15, %s3645_s3, %s3645_s3, %s3646_s21   ;;  %v2391_v36 = vunpack.c.h.bf16 %v4493_v45  ;;  %v2394_v2 = vunpack.c.l.bf16 %v4540_v44  ;;  %v2400_v59 = vunpack.c.l.bf16 %v3396_v20  ;;  %v2401_v49 = vunpack.c.h.bf16 %v3396_v20 }
 0x461   : > { %v2559_v50 = vadd.f32 %v2558_v38, %v2451_v41  ;;  %v2584_v55 = vadd.f32 %v2461_v1, %v2460_v19  ;;  %v2447_v24 = vmul.f32 %v2383_v9, %v2214_v15  ;;  %v3397_v43 = vld [vmem:[%s3876_s20 + $0xd8] sm:$0xff]   ;;  %v2398_v62 = vunpack.c.l.bf16 %v3398_v29  ;;  %v3399_v4 = vld [vmem:[%s3876_s20 + $0xe0] sm:$0xff]   ;;  %v3400_v1 = vld [vmem:[%s3876_s20 + $0xf0] sm:$0xff]   ;;  %s4631_s17 = scalar_lea.hbm %s4685_s6, %s2919_s19  ;;  %s3647_s28 = smov [#allocation10]  }
 0x462   : > { %v2402_v0 = vunpack.c.l.bf16 %v3397_v43  ;;  %v2464_v47 = vmul.f32 %v2400_v59, %v2297_v58  ;;  %v2404_v57 = vunpack.c.l.bf16 %v3399_v4  ;;  %v2399_v11 = vunpack.c.h.bf16 %v3398_v29  ;;  %s3557_s9 = sshll.u32 %s3647_s28, 4  ;;  %s3558_s9 = int_to_ptr.vmem [resolvable:$false] %s3557_s9 }
 0x463   : > { %v2560_v10 = vrot.slane %v2559_v50, 4  ;;  %v2550_v3 = vadd.f32 %v4490_v32, %v2447_v24  ;;  %v2252_v51 = vpop.permute.xlu0 %2251  ;;  %v2267_v18 = vpop.permute.xlu1 %2266  ;;  %v2405_v32 = vunpack.c.h.bf16 %v3399_v4  ;;  %v2395_v13 = vunpack.c.h.bf16 %v4540_v44  ;;  %s3559_s19 = scalar_lea.vmem %s3558_s9, 512 }
 0x464   : > { %v2455_v5 = vmul.f32 %v2391_v36, %v2252_v51  ;;  %v2458_v37 = vmul.f32 %v2394_v2, %v2267_v18  ;;  %v2409_v9 = vunpack.c.h.bf16 %v3400_v1  ;;  %v2403_v15 = vunpack.c.h.bf16 %v3397_v43  ;;  %v4557_v43 = vld [vmem:[%s3876_s20 + $0xf8] sm:$0xff]  }
 0x465   : > { %v2561_v31 = vadd.f32 %v2560_v10, %v2559_v50  ;;  %v2551_v34 = vrot.slane %v2550_v3, 4  ;;  %v2408_v36 = vunpack.c.l.bf16 %v3400_v1 }
 0x466   : > { %v2568_v39 = vadd.f32 %v2567_v63, %v2455_v5  ;;  %v2576_v23 = vadd.f32 %v4496_v33, %v2458_v37  ;;  %v3401_v37 = vld [vmem:[%s3876_s20 + $0xe8] sm:$0xff]  }
 0x467   : > { %v2562_v35 = vrot.slane %v2561_v31, 2  ;;  %v2552_v54 = vadd.f32 %v2551_v34, %v2550_v3  ;;  %v2316_v14 = vpop.permute.xlu0 %2315  ;;  %v2301_v42 = vpop.permute.xlu1 %2300  ;;  %v2406_v20 = vunpack.c.l.bf16 %v3401_v37 }
 0x468   : > { %v2569_v22 = vrot.slane %v2568_v39, 4  ;;  %v2465_v48 = vmul.f32 %v2401_v49, %v2301_v42  ;;  %v2468_v21 = vmul.f32 %v2404_v57, %v2316_v14 }
 0x469   : > { %v2563_v7 = vadd.f32 %v2562_v35, %v2561_v31  ;;  %v2553_v12 = vrot.slane %v2552_v54, 2 }
 0x46a   : > { %v2570_v8 = vadd.f32 %v2569_v22, %v2568_v39  ;;  %v2593_v27 = vadd.f32 %v2465_v48, %v2464_v47 }
 0x46b   : > { %v2564_v17 = vrot.slane %v2563_v7, 1  ;;  %v2554_v30 = vadd.f32 %v2553_v12, %v2552_v54  ;;  %v2305_v25 = vpop.permute.xlu0 %2304  ;;  %v2286_v38 = vpop.permute.xlu1 %2285 }
 0x46c   : > { %v2571_v28 = vrot.slane %v2570_v8, 2  ;;  %v2466_v60 = vmul.f32 %v2402_v0, %v2305_v25  ;;  %v2462_v26 = vmul.f32 %v2398_v62, %v2286_v38  ;;  %v2410_v0 = vunpack.c.l.bf16 %v4557_v43 }
 0x46d   : > { %v2555_v53 = vrot.slane %v2554_v30, 1  ;;  %v2565_v45 = vadd.f32 %v2564_v17, %v2563_v7 }
 0x46e   : > { %v2572_v33 = vadd.f32 %v2571_v28, %v2570_v8  ;;  %v2594_v16 = vadd.f32 %v2593_v27, %v2466_v60  ;;  %v2585_v46 = vadd.f32 %v2584_v55, %v2462_v26  ;;  %v2407_v27 = vunpack.c.h.bf16 %v3401_v37  ;;  %v3405_v37 = vld [vmem:[%s3876_s20 + $0x30] sm:$0xff]  }
 0x46f   : > { %v2556_v52 = vadd.f32 %v2555_v53, %v2554_v30  ;;  %v2339_v56 = vpop.permute.xlu0 %2338  ;;  %v2320_v6 = vpop.permute.xlu1 %2319 }
 0x470   : > { %v2573_v63 = vrot.slane %v2572_v33, 1  ;;  %v2469_v40 = vmul.f32 %v2405_v32, %v2320_v6  ;;  %v2473_v31 = vmul.f32 %v2409_v9, %v2339_v56 }
 0x471   : > { %v2643_v61 = vsel %vm1996_vm4, %v2565_v45, %v2556_v52 }
 0x472   : > { %v2574_v19 = vadd.f32 %v2573_v63, %v2572_v33  ;;  %v2602_v41 = vadd.f32 %v2469_v40, %v2468_v21 }
 0x473   : > { %v2290_v50 = vpop.permute.xlu0 %2289  ;;  %v2271_v58 = vpop.permute.xlu1 %2270 }
 0x474   : > { %v2644_v55 = vsel %vm1998_vm5, %v2574_v19, %v2643_v61  ;;  %v2463_v10 = vmul.f32 %v2399_v11, %v2290_v50  ;;  %v2459_v24 = vmul.f32 %v2395_v13, %v2271_v58 }
 0x476   : > { %v2586_v2 = vadd.f32 %v2585_v46, %v2463_v10  ;;  %v2577_v44 = vadd.f32 %v2576_v23, %v2459_v24 }
 0x477   : > { %v2309_v3 = vpop.permute.xlu0 %2308  ;;  %v2335_v51 = vpop.permute.xlu1 %2334 }
 0x478   : > { %v2587_v18 = vrot.slane %v2586_v2, 4  ;;  %v2578_v35 = vrot.slane %v2577_v44, 4  ;;  %v2467_v34 = vmul.f32 %v2403_v15, %v2309_v3  ;;  %v2472_v5 = vmul.f32 %v2408_v36, %v2335_v51 }
 0x47a   : > { %v2588_v59 = vadd.f32 %v2587_v18, %v2586_v2  ;;  %v2579_v49 = vadd.f32 %v2578_v35, %v2577_v44  ;;  %v2595_v7 = vadd.f32 %v2594_v16, %v2467_v34  ;;  %v2611_v54 = vadd.f32 %v2473_v31, %v2472_v5  ;;  %v3403_v31 = vld [vmem:[%s3876_s20 + $0x10] sm:$0xff]   ;;  %v3404_v34 = vld [vmem:[%s3876_s20 + $0x20] sm:$0xff]  }
 0x47b   : > { %v4554_v39 = vpop.permute.xlu0 %2049  ;;  %v2324_v14 = vpop.permute.xlu1 %2323  ;;  %v2353_v3 = vunpack.c.h.bf16 %v3403_v31  ;;  %v2352_v35 = vunpack.c.l.bf16 %v3403_v31  ;;  %v2357_v5 = vunpack.c.h.bf16 %v3404_v34  ;;  %v3414_v31 = vld [vmem:[%s3876_s20 + $0x58] sm:$0xff]  }
 0x47c   : > { %v2589_v42 = vrot.slane %v2588_v59, 2  ;;  %v2580_v12 = vrot.slane %v2579_v49, 2  ;;  %v2596_v23 = vrot.slane %v2595_v7, 4  ;;  %v2470_v22 = vmul.f32 %v2406_v20, %v2324_v14 }
 0x47d   : > { %v2361_v20 = vunpack.c.h.bf16 %v3405_v37 }
 0x47e   : > { %v2590_v29 = vadd.f32 %v2589_v42, %v2588_v59  ;;  %v2581_v62 = vadd.f32 %v2580_v12, %v2579_v49  ;;  %v2597_v17 = vadd.f32 %v2596_v23, %v2595_v7  ;;  %v2603_v47 = vadd.f32 %v2602_v41, %v2470_v22  ;;  %v3406_v59 = vld [vmem:[%s3876_s20] sm:$0xff]   ;;  %v3407_v12 = vld [vmem:[%s3876_s20 + $0x18] sm:$0xff]  }
 0x47f   : > { %v2069_v48 = vpop.permute.xlu0 %2068  ;;  %v2343_v30 = vpop.permute.xlu1 %2342  ;;  %v2348_v49 = vunpack.c.l.bf16 %v3406_v59  ;;  %v2356_v7 = vunpack.c.l.bf16 %v3404_v34  ;;  %v2354_v23 = vunpack.c.l.bf16 %v3407_v12  ;;  %v2349_v22 = vunpack.c.h.bf16 %v3406_v59 }
 0x480   : > { %v2591_v8 = vrot.slane %v2590_v29, 1  ;;  %v2582_v4 = vrot.slane %v2581_v62, 1  ;;  %v2598_v57 = vrot.slane %v2597_v17, 2  ;;  %v2474_v25 = vmul.f32 %v2410_v0, %v2343_v30  ;;  %v3408_v0 = vld [vmem:[%s3876_s20 + $0x28] sm:$0xff]  }
 0x482   : > { %v2592_v38 = vadd.f32 %v2591_v8, %v2590_v29  ;;  %v2583_v32 = vadd.f32 %v2582_v4, %v2581_v62  ;;  %v2599_v53 = vadd.f32 %v2598_v57, %v2597_v17  ;;  %v4560_v28 = vadd.f32 %v2611_v54, %v2474_v25  ;;  %v3410_v57 = vld [vmem:[%s3876_s20 + $0x38] sm:$0xff]   ;;  %v3411_v25 = vld [vmem:[%s3876_s20 + $0x40] sm:$0xff]  }
 0x483   : > { %v4562_v60 = vpop.permute.xlu0 %2076  ;;  %v2328_v26 = vpop.permute.xlu1 %2327  ;;  %v2358_v29 = vunpack.c.l.bf16 %v3408_v0  ;;  %v2360_v62 = vunpack.c.l.bf16 %v3405_v37  ;;  %v2416_v17 = vmul.f32 %v2352_v35, %v2069_v48 }
 0x484   : > { %v2645_v45 = vsel %vm2000_vm6, %v2583_v32, %v2644_v55  ;;  %v2600_v52 = vrot.slane %v2599_v53, 1  ;;  %v2471_v33 = vmul.f32 %v2407_v27, %v2328_v26  ;;  %v2362_v27 = vunpack.c.l.bf16 %v3410_v57 }
 0x485   : > { %v2646_v16 = vsel %vm2002_vm7, %v2592_v38, %v2645_v45  ;;  %v2364_v38 = vunpack.c.l.bf16 %v3411_v25  ;;  %v2355_v32 = vunpack.c.h.bf16 %v3407_v12 }
 0x486   : > { %v2601_v46 = vadd.f32 %v2600_v52, %v2599_v53  ;;  %v2604_v56 = vadd.f32 %v2603_v47, %v2471_v33  ;;  %v3409_v47 = vld [vmem:[%s3876_s20 + $0x8] sm:$0xff]  }
 0x487   : > { %v2088_v6 = vpop.permute.xlu0 %2087  ;;  %v2054_v11 = vpop.permute.xlu1 %2053  ;;  %v2350_v30 = vunpack.c.l.bf16 %v3409_v47  ;;  %v2351_v8 = vunpack.c.h.bf16 %v3409_v47  ;;  %v3412_v52 = vld [vmem:[%s3876_s20 + $0x48] sm:$0xff]  }
 0x488   : > { %v2647_v13 = vsel %vm2004_vm8, %v2601_v46, %v2646_v16  ;;  %v2605_v61 = vrot.slane %v2604_v56, 4  ;;  %v2420_v26 = vmul.f32 %v2356_v7, %v2088_v6  ;;  %v2366_v33 = vunpack.c.l.bf16 %v3412_v52  ;;  %v3413_v16 = vld [vmem:[%s3876_s20 + $0x50] sm:$0xff]  }
 0x489   : > { %v2368_v46 = vunpack.c.l.bf16 %v3413_v16  ;;  %v2412_v6 = vmul.f32 %v2348_v49, %v4554_v39  ;;  %v2367_v35 = vunpack.c.h.bf16 %v3412_v52 }
 0x48a   : > { %v2606_v63 = vadd.f32 %v2605_v61, %v2604_v56 }
 0x48b   : > { %v4567_v21 = vpop.permute.xlu0 %2095  ;;  %v4569_v40 = vpop.permute.xlu1 %2057 }
 0x48c   : > { %v2607_v19 = vrot.slane %v2606_v63, 2  ;;  %v2422_v34 = vmul.f32 %v2358_v29, %v4567_v21 }
 0x48e   : > { %v2608_v41 = vadd.f32 %v2607_v19, %v2606_v63  ;;  %v2359_v63 = vunpack.c.h.bf16 %v3408_v0  ;;  %v2365_v19 = vunpack.c.h.bf16 %v3411_v25  ;;  %v3415_v25 = vld [vmem:[%s3876_s20 + $0x60] sm:$0xff]  }
 0x48f   : > { %v2107_v1 = vpop.permute.xlu0 %2106  ;;  %v4571_v9 = vpop.permute.xlu1 %2061 }
 0x490   : > { %v2609_v50 = vrot.slane %v2608_v41, 1  ;;  %v2424_v61 = vmul.f32 %v2360_v62, %v2107_v1  ;;  %v2415_v39 = vmul.f32 %v2351_v8, %v4571_v9 }
 0x492   : > { %v2610_v58 = vadd.f32 %v2609_v50, %v2608_v41  ;;  %v2418_v41 = vmul.f32 %v2354_v23, %v4562_v60 }
 0x493   : > { %v4573_v15 = vpop.permute.xlu0 %2114  ;;  %v2073_v55 = vpop.permute.xlu1 %2072 }
 0x494   : > { %v4576_v10 = vsel %vm2006_vm11, %v2610_v58, %v2647_v13  ;;  %v2417_v54 = vmul.f32 %v2353_v3, %v2073_v55  ;;  %v2413_v13 = vmul.f32 %v2349_v22, %v2054_v11  ;;  %v2369_v58 = vunpack.c.h.bf16 %v3413_v16 }
 0x495   : > { %v2363_v55 = vunpack.c.h.bf16 %v3410_v57  ;;  %v2370_v3 = vunpack.c.l.bf16 %v3414_v31  ;;  %v2426_v60 = vmul.f32 %v2362_v27, %v4573_v15  ;;  %v2371_v15 = vunpack.c.h.bf16 %v3414_v31 }
 0x496   : > { %v2485_v45 = vadd.f32 %v2417_v54, %v2416_v17  ;;  %v2476_v59 = vadd.f32 %v2413_v13, %v2412_v6 }
 0x497   : > { %v4578_v24 = vpop.permute.xlu0 %2125  ;;  %v2081_v36 = vpop.permute.xlu1 %2080 }
 0x498   : > { %v2486_v37 = vadd.f32 %v2485_v45, %v2418_v41  ;;  %v2419_v11 = vmul.f32 %v2355_v32, %v2081_v36  ;;  %v2428_v7 = vmul.f32 %v2364_v38, %v4578_v24  ;;  %v2373_v38 = vunpack.c.h.bf16 %v3415_v25  ;;  %v3417_v41 = vld [vmem:[%s3876_s20 + $0x68] sm:$0xff]  }
 0x49a   : > { %v2487_v0 = vadd.f32 %v2486_v37, %v2419_v11  ;;  %v3418_v11 = vld [vmem:[%s3876_s20 + $0x78] sm:$0xff]  }
 0x49b   : > { %v4580_v2 = vpop.permute.xlu0 %2133  ;;  %v2092_v44 = vpop.permute.xlu1 %2091 }
 0x49c   : > { %v2421_v4 = vmul.f32 %v2357_v5, %v2092_v44  ;;  %v2414_v5 = vmul.f32 %v2350_v30, %v4569_v40  ;;  %v2430_v49 = vmul.f32 %v2366_v33, %v4580_v2 }
 0x49e   : > { %v2494_v50 = vadd.f32 %v2421_v4, %v2420_v26  ;;  %v2477_v36 = vadd.f32 %v2476_v59, %v2414_v5 }
 0x49f   : > { %v4583_v51 = vpop.permute.xlu0 %2144  ;;  %v4585_v18 = vpop.permute.xlu1 %2099 }
 0x4a0   : > { %v2423_v12 = vmul.f32 %v2359_v63, %v4585_v18  ;;  %v2432_v24 = vmul.f32 %v2368_v46, %v4583_v51  ;;  %v2478_v30 = vadd.f32 %v2477_v36, %v2415_v39  ;;  %v2488_v18 = vrot.slane %v2487_v0, 4  ;;  %v3416_v63 = vld [vmem:[%s3876_s20 + $0x70] sm:$0xff]   ;;  %s370_s20 = scalar_lea.vmem [#allocation10], %s2855_s22  ;;  %s2657_s22 = scalar_lea.sflag [#allocation4], %s3872_s26 }
 0x4a1   : > { %v2372_v51 = vunpack.c.l.bf16 %v3415_v25  ;;  %s2675_s16 = sshll.u32 %s370_s20, 4  ;;  %s4633_s16 = int_to_ptr.vmem [resolvable:$true] %s2675_s16 }
 0x4a2   : > { %v2479_v26 = vrot.slane %v2478_v30, 4  ;;  %v2489_v16 = vadd.f32 %v2488_v18, %v2487_v0  ;;  %v2411_v0 = vunpack.c.h.bf16 %v4557_v43  ;;  %s3553_s0 = scalar_lea.vmem %s4633_s16, 256  ;;  %p3560_p13 = scmp.lt.s32.totalorder %s4633_s16, %s3558_s9 }
 0x4a3   : > { %v2149_v14 = vpop.permute.xlu0 %2148  ;;  %v2111_v42 = vpop.permute.xlu1 %2110  ;;  %p3554_p3 = scmp.ne.s32.totalorder %s4633_s16, %s3553_s0  ;;  %p3561_p1 = scmp.lt.s32.totalorder %s3559_s19, %s3553_s0 }
 0x4a4   : > { %v2425_v53 = vmul.f32 %v2361_v20, %v2111_v42  ;;  %v2495_v42 = vadd.f32 %v2494_v50, %v2422_v34  ;;  %v2433_v21 = vmul.f32 %v2369_v58, %v2149_v14  ;;  %v2374_v50 = vunpack.c.l.bf16 %v3417_v41 }
 0x4a5   : > { %v2480_v58 = vadd.f32 %v2479_v26, %v2478_v30  ;;  %v2490_v34 = vrot.slane %v2489_v16, 2  ;;  %p3555_p11 = pnand %p3554_p3, %p4722_p10  ;;  %p3562_p4 = por %p3561_p1, %p3560_p13 }
 0x4a6   : > { %v2503_v44 = vadd.f32 %v2425_v53, %v2424_v61  ;;  %v2496_v2 = vadd.f32 %v2495_v42, %v2423_v12  ;;  %v2521_v8 = vadd.f32 %v2433_v21, %v2432_v24 }
 0x4a7   : > { %v4597_v56 = vpop.permute.xlu0 %2163  ;;  %v2119_v48 = vpop.permute.xlu1 %2118  ;;  %p3556_p9 = pneg %p3555_p11 }
 0x4a8   : > { %v2504_v23 = vadd.f32 %v2503_v44, %v2426_v60  ;;  %v2427_v40 = vmul.f32 %v2363_v55, %v2119_v48  ;;  %v2497_v45 = vrot.slane %v2496_v2, 4  ;;  %v2436_v44 = vmul.f32 %v2372_v51, %v4597_v56 }
 0x4a9   : > { %v2491_v56 = vadd.f32 %v2490_v34, %v2489_v16  ;;  %p3563_p5 = pnand %p3562_p4, %p3556_p9 }
 0x4aa   : > { %v2505_v4 = vadd.f32 %v2504_v23, %v2427_v40  ;;  %v2498_v55 = vadd.f32 %v2497_v45, %v2496_v2 }
 0x4ab   : > { %v2153_v1 = vpop.permute.xlu0 %2152  ;;  %v2130_v20 = vpop.permute.xlu1 %2129  ;;  %v2492_v18 = vrot.slane %v2491_v56, 1 }
 0x4ac   : > { %v2429_v54 = vmul.f32 %v2365_v19, %v2130_v20  ;;  %v2434_v17 = vmul.f32 %v2370_v3, %v2153_v1  ;;  %v2506_v52 = vrot.slane %v2505_v4, 4  ;;  %v2376_v19 = vunpack.c.l.bf16 %v3416_v63 }
 0x4ad   : > { %v2377_v3 = vunpack.c.h.bf16 %v3416_v63  ;;  %v2378_v1 = vunpack.c.l.bf16 %v3418_v11  ;;  %v2499_v39 = vrot.slane %v2498_v55, 2 }
 0x4ae   : > { %v2512_v22 = vadd.f32 %v2429_v54, %v2428_v7  ;;  %v2522_v32 = vadd.f32 %v2521_v8, %v2434_v17  ;;  %v2507_v31 = vadd.f32 %v2506_v52, %v2505_v4  ;;  %v2481_v54 = vrot.slane %v2480_v58, 2 }
 0x4af   : > { %v2187_v29 = vpop.permute.xlu0 %2186  ;;  %v2138_v62 = vpop.permute.xlu1 %2137  ;;  %v2493_v52 = vadd.f32 %v2492_v18, %v2491_v56 }
 0x4b0   : > { %v2513_v47 = vadd.f32 %v2512_v22, %v2430_v49  ;;  %v2431_v9 = vmul.f32 %v2367_v35, %v2138_v62  ;;  %v2375_v35 = vunpack.c.h.bf16 %v3417_v41  ;;  %v2379_v49 = vunpack.c.h.bf16 %v3418_v11 }
 0x4b1   : > { %v2508_v42 = vrot.slane %v2507_v31, 2  ;;  %v2441_v12 = vmul.f32 %v2377_v3, %v2187_v29 }
 0x4b2   : > { %v2514_v14 = vadd.f32 %v2513_v47, %v2431_v9  ;;  %v2482_v47 = vadd.f32 %v2481_v54, %v2480_v58  ;;  %v2500_v9 = vadd.f32 %v2499_v39, %v2498_v55 }
 0x4b3   : > { %v2157_v57 = vpop.permute.xlu0 %2156  ;;  %v2168_v27 = vpop.permute.xlu1 %2167  ;;  %v2509_v30 = vadd.f32 %v2508_v42, %v2507_v31 }
 0x4b4   : > { %v2435_v53 = vmul.f32 %v2371_v15, %v2157_v57  ;;  %v2515_v46 = vrot.slane %v2514_v14, 4  ;;  %v2437_v61 = vmul.f32 %v2373_v38, %v2168_v27 }
 0x4b5   : > { %v2510_v43 = vrot.slane %v2509_v30, 1 }
 0x4b6   : > { %v2523_v33 = vadd.f32 %v2522_v32, %v2435_v53  ;;  %v2516_v5 = vadd.f32 %v2515_v46, %v2514_v14  ;;  %v2530_v59 = vadd.f32 %v2437_v61, %v2436_v44  ;;  %v2483_v32 = vrot.slane %v2482_v47, 1 }
 0x4b7   : > { %v2183_v48 = vpop.permute.xlu1 %2182  ;;  %v2176_v6 = vpop.permute.xlu0 %2175  ;;  %v2501_v53 = vrot.slane %v2500_v9, 1 }
 0x4b8   : > { %v2524_v13 = vrot.slane %v2523_v33, 4  ;;  %v2440_v60 = vmul.f32 %v2376_v19, %v2183_v48  ;;  %v2439_v21 = vmul.f32 %v2375_v35, %v2176_v6  ;;  %v2517_v40 = vrot.slane %v2516_v5, 2 }
 0x4b9   : > { %v2484_v61 = vadd.f32 %v2483_v32, %v2482_v47  ;;  %v2502_v63 = vadd.f32 %v2501_v53, %v2500_v9  ;;  %v2511_v19 = vadd.f32 %v2510_v43, %v2509_v30 }
 0x4ba   : > { %v2525_v20 = vadd.f32 %v2524_v13, %v2523_v33  ;;  %v2539_v15 = vadd.f32 %v2441_v12, %v2440_v60  ;;  %v2518_v29 = vadd.f32 %v2517_v40, %v2516_v5 }
 0x4bb   : > { %v2172_v37 = vpop.permute.xlu1 %2171  ;;  %v2195_v22 = vpop.permute.xlu0 %2194  ;;  %v2636_v6 = vsel %vm1996_vm4, %v2493_v52, %v2484_v61 }
 0x4bc   : > { %v2438_v7 = vmul.f32 %v2374_v50, %v2172_v37  ;;  %v2526_v62 = vrot.slane %v2525_v20, 2  ;;  %v2443_v2 = vmul.f32 %v2379_v49, %v2195_v22  ;;  %v2519_v33 = vrot.slane %v2518_v29, 1 }
 0x4be   : > { %v2531_v23 = vadd.f32 %v2530_v59, %v2438_v7  ;;  %v2527_v57 = vadd.f32 %v2526_v62, %v2525_v20  ;;  %v2520_v55 = vadd.f32 %v2519_v33, %v2518_v29 }
 0x4bf   : > { %v2191_v36 = vpop.permute.xlu1 %2190 }
 0x4c0   : > { %v2532_v24 = vadd.f32 %v2531_v23, %v2439_v21  ;;  %v2442_v17 = vmul.f32 %v2378_v1, %v2191_v36  ;;  %v2528_v16 = vrot.slane %v2527_v57, 1 }
 0x4c2   : > { %v2533_v8 = vrot.slane %v2532_v24, 4  ;;  %v2540_v4 = vadd.f32 %v2539_v15, %v2442_v17  ;;  %v2529_v44 = vadd.f32 %v2528_v16, %v2527_v57 }
 0x4c3   : > { %v2347_v14 = vpop.permute.xlu1 %2346 }
 0x4c4   : > { %v2534_v27 = vadd.f32 %v2533_v8, %v2532_v24  ;;  %v2541_v25 = vadd.f32 %v2540_v4, %v2443_v2  ;;  %v2475_v38 = vmul.f32 %v2411_v0, %v2347_v14 }
 0x4c6   : > { %v2535_v26 = vrot.slane %v2534_v27, 2  ;;  %v2542_v45 = vrot.slane %v2541_v25, 4  ;;  %v2613_v51 = vadd.f32 %v4560_v28, %v2475_v38  ;;  %v2637_v28 = vsel %vm1998_vm5, %v2502_v63, %v2636_v6 }
 0x4c7   : > { %v2638_v34 = vsel %vm2000_vm6, %v2511_v19, %v2637_v28 }
 0x4c8   : > { %v2536_v46 = vadd.f32 %v2535_v26, %v2534_v27  ;;  %v2543_v48 = vadd.f32 %v2542_v45, %v2541_v25  ;;  %v2614_v13 = vrot.slane %v2613_v51, 4  ;;  %v2639_v11 = vsel %vm2002_vm7, %v2520_v55, %v2638_v34 }
 0x4c9   : > { %v2640_v1 = vsel %vm2004_vm8, %v2529_v44, %v2639_v11 }
 0x4ca   : > { %v2537_v41 = vrot.slane %v2536_v46, 1  ;;  %v2544_v50 = vrot.slane %v2543_v48, 2  ;;  %v2615_v58 = vadd.f32 %v2614_v13, %v2613_v51 }
 0x4cc   : > { %v2545_v31 = vadd.f32 %v2544_v50, %v2543_v48  ;;  %v2616_v3 = vrot.slane %v2615_v58, 2  ;;  %v2538_v35 = vadd.f32 %v2537_v41, %v2536_v46 }
 0x4ce   : > { %v2546_v5 = vrot.slane %v2545_v31, 1  ;;  %v2617_v37 = vadd.f32 %v2616_v3, %v2615_v58  ;;  %v2641_v60 = vsel %vm2006_vm11, %v2538_v35, %v2640_v1 }
 0x4d0   : > { %v2547_v20 = vadd.f32 %v2546_v5, %v2545_v31  ;;  %v2618_v59 = vrot.slane %v2617_v37, 1 }
 0x4d2   : > { %v2642_v7 = vsel %vm2008_vm9, %v2547_v20, %v2641_v60  ;;  %v2619_v54 = vadd.f32 %v2618_v59, %v2617_v37 }
 0x4d3   : > { %2652 = vst [vmem:[%s370_s20] sm:$0xff] %v2642_v7 }
 0x4d4   : > { %v2649_v39 = vsel %vm2008_vm9, %v2619_v54, %v4576_v10 }
 0x4d5   : > { %2653 = vst [vmem:[%s370_s20 + $0x8] sm:$0xff] %v2649_v39 }
 0x4d6   : > { %3566 = shalt.err (!%p3563_p5)
}
 0x4d7   : > { %s3567_s12 = scalar_lea.hbm %s4631_s17, 256  ;;  %s3571_s30 = scalar_lea.hbm %s4685_s6, 512 }
 0x4d8   : > { %p3568_p7 = scmp.ne.s32.totalorder %s4631_s17, %s3567_s12  ;;  %p3572_p6 = scmp.lt.s32.totalorder %s4631_s17, %s4685_s6 }
 0x4d9   : > { %p3573_p12 = scmp.lt.s32.totalorder %s3571_s30, %s3567_s12 }
 0x4da   : > { %p3569_p8 = pnand %p3568_p7, %p4722_p10 }
 0x4db   : > { %p3574_p0 = por %p3573_p12, %p3572_p6 }
 0x4dc   : > { %p3570_p2 = pneg %p3569_p8 }
 0x4de   : > { %p3575_p3 = pnand %p3574_p0, %p3570_p2 }
 0x4e0   : > { %3578 = shalt.err (!%p3575_p3)
}
 0x4e1   : > { %3098 = dma.vmem_to_hbm [thread:$0]  (%p4722_p10), %s4633_s16, 256, %s4631_s17, %s2657_s22, %s3645_s3, %s3645_s3, %s3646_s21  }
 0x4e2 PF: > { %s2706_s10 = sand.u32 1, %s3621_s24   ;;  %p4723_p11 = scmp.ne.s32.totalorder %s4702_s8, 0 }
 0x4e3   : > { %p4724_p9 = scmp.ge.s32.totalorder %s3633_s27, 2  ;;  %s2707_s13 = scalar_lea.sflag [#allocation4], %s2706_s10 }
 0x4e5   : > { %p3117_p13 = pnand %p4724_p9, %p4723_p11 }
 0x4e7   : > { %p3118_p1 = pneg %p3117_p13 }
 0x4e9   : > { %3612 = dma.done.wait (%p3118_p1), %s2707_s13, 256  }
 0x4ea   : > { %3614 = vsyncadd (%p3118_p1), %s2707_s13, 4294967040  ;;  %s2716_s20 = scalar_lea.sflag [#allocation12], %s2706_s10 }
 0x4eb   : > { %3616 = dma.done.wait (%p3118_p1), %s2716_s20, 256  }
 0x4ec   : > { %3618 = vsyncadd (%p3118_p1), %s2716_s20, 4294967040  ;;  %s4725_s11 = sld [smem:[#allocation19_spill]]  ;;  %p28_p10 = scmp.ge.s32.totalorder %s3766_s23, 4  }
 0x4ed   : > { %s4726_s26 = sld [smem:[#allocation20_spill]]  ;;  %s4727_s24 = smov %s3625_s25 }
 0x4ee   : > { %s4729_s27 = smov %s3766_s23  ;;  %30 = sbr.rel (!%p28_p10) target bundleno = 14 (0xe), region = 127 }
 0x4f2   : > { %s4728_s25 = smov %s4725_s11 }
 0x4f3   :  { %2721 = vsyncpa [#allocation3], 1 }
 0x4f4   :  { %2723 = vsyncpa [#allocation3 + $0x1], 1 }
 0x4f5   :  { %2724 = vsyncpa [#allocation6], 1 }
 0x4f6   :  { %2726 = vsyncpa [#allocation6 + $0x1], 1 }
 0x4f7   :  { %2727 = vsyncpa [#allocation9], 1 }
 0x4f8   :  { %2728 = vsyncpa [#allocation4], 1 }
 0x4f9   :  { %2730 = vsyncpa [#allocation4 + $0x1], 1 }
 0x4fa   :  { %2731 = vsyncpa [#allocation12], 1 }
 0x4fb   :  { %2733 = vsyncpa [#allocation12 + $0x1], 1 }

</bundles_post_ra>
